<compile_context>
chip_gen: v7x
topology: tpu7x:2x2x1
jax: 0.10.0
libtpu: 0.0.40
codegen_flags: <defaults>
</compile_context>

<pallas_src>
import jax
import jax.numpy as jnp
from jax.experimental import pallas as pl
from jax.experimental.pallas import tpu as pltpu

LANES = 128
MAX_TILE_M = 2048                      # large M tiles amortize per-step overhead
GEMM_CHUNK = 256                       # rows per in-kernel GEMM chunk (vreg-safe)
POOL_BLOCK_BYTES = 2 * 1024 * 1024     # byte budget for one pool input block
VMEM_LIMIT_BYTES = 32 * 1024 * 1024
BN_EPS = 1e-5


def _round_up(x, m):
    return (x + m - 1) // m * m


def _largest_divisor_leq(n, cap):
    for d in range(min(n, cap), 0, -1):
        if n % d == 0:
            return d
    return 1


def _choose_m_tiling(m):
    """Pick (TILE_M, M_pad) for the row dim M = N*H*W.

    Prefers exact divisors of M (no pad -> no post-kernel slice copy),
    MXU-friendly multiples of 256 up to MAX_TILE_M, and always leaves >= 2
    grid steps so both of v7x's TensorCores get work.
    """
    for t in range(MAX_TILE_M, 255, -256):
        if m % t == 0 and m // t >= 2:
            return t, m
    if m % 8 == 0:
        start = max(8, min(m // 2, 256) // 8 * 8)
        for t in range(start, 7, -8):
            if m % t == 0 and m // t >= 2:
                return t, m
    # Ragged fallback: pad rows (zero patch rows contribute nothing to the BN
    # partial sums; we divide by the true M).
    t = 256
    return t, _round_up(max(m, 2 * t), t)


def _chunk_rows(tile_m):
    return _largest_divisor_leq(tile_m, GEMM_CHUNK)


# ----------------------------------------------------------------------------
# Kernels
# ----------------------------------------------------------------------------
def conv_stats_kernel(patches_ref, w_ref, stats_ref):
    """Pass 1 (non-last blocks): per-tile BN partial sums of the conv output.

    The conv GEMM is recomputed in pass 2, so only the tiny (8, CP) stat tile
    ever hits HBM (row 0 = sum, row 1 = sum-of-squares).
    """
    tile_m = patches_ref.shape[0]
    chunk = _chunk_rows(tile_m)
    stats_ref[...] = jnp.zeros_like(stats_ref)

    @pl.loop(0, tile_m // chunk)
    def _(i):
        start = pl.multiple_of(i * chunk, chunk)
        acc = jnp.dot(patches_ref[pl.ds(start, chunk), :], w_ref[...],
                      preferred_element_type=jnp.float32)
        stats_ref[0:1, :] += jnp.sum(acc, axis=0, keepdims=True)
        stats_ref[1:2, :] += jnp.sum(acc * acc, axis=0, keepdims=True)


def conv_stats_store_kernel(patches_ref, w_ref, conv_ref, stats_ref):
    """Pass 1 (last block): same stats, plus the raw conv tile in bf16 so the
    fused BN+ReLU+maxpool kernel can consume it directly (no pass 2)."""
    tile_m = patches_ref.shape[0]
    chunk = _chunk_rows(tile_m)
    stats_ref[...] = jnp.zeros_like(stats_ref)

    @pl.loop(0, tile_m // chunk)
    def _(i):
        start = pl.multiple_of(i * chunk, chunk)
        acc = jnp.dot(patches_ref[pl.ds(start, chunk), :], w_ref[...],
                      preferred_element_type=jnp.float32)
        conv_ref[pl.ds(start, chunk), :] = acc.astype(conv_ref.dtype)
        stats_ref[0:1, :] += jnp.sum(acc, axis=0, keepdims=True)
        stats_ref[1:2, :] += jnp.sum(acc * acc, axis=0, keepdims=True)


def conv_bn_relu_kernel(patches_ref, w_ref, scale_ref, shift_ref, out_ref):
    """Pass 2 (non-last blocks): recompute the skinny GEMM, apply the folded
    BN affine (y = conv*scale + shift) and ReLU, emit only the real channels
    in bf16 (the next block consumes bf16 anyway)."""
    tile_m = patches_ref.shape[0]
    cout = out_ref.shape[1]
    chunk = _chunk_rows(tile_m)

    @pl.loop(0, tile_m // chunk)
    def _(i):
        start = pl.multiple_of(i * chunk, chunk)
        acc = jnp.dot(patches_ref[pl.ds(start, chunk), :], w_ref[...],
                      preferred_element_type=jnp.float32)
        y = jnp.maximum(acc * scale_ref[...] + shift_ref[...], 0.0)
        out_ref[pl.ds(start, chunk), :] = y[:, :cout].astype(out_ref.dtype)


def bn_relu_pool_kernel(conv_ref, scale2_ref, shift2_ref, out_ref, idx_ref):
    """Fused tail: BN affine + ReLU + 2x2/stride-2 max pool with PyTorch-style
    flat H*W argmax indices (int32; PyTorch returns int64).

    conv_ref:        (1, tile_hh, 2, Wh, 2*CP) bf16 raw conv, lane-packed W phases
    scale2 / shift2: (1, 2*CP) f32 BN affine duplicated across both W phases
    out_ref:         (1, tile_hh, Wh, CP) f32
    idx_ref:         (1, tile_hh, Wh, CP) i32
    """
    _, tile_hh, wh, cdim = out_ref.shape
    w_full = 2 * wh

    y = jnp.maximum(conv_ref[0].astype(jnp.float32) * scale2_ref[...]
                    + shift2_ref[...], 0.0)          # (tile_hh, 2, Wh, 2*CP)
    a = y[:, 0, :, :cdim]              # top-left
    b = y[:, 0, :, cdim:]              # top-right
    c = y[:, 1, :, :cdim]              # bottom-left
    d = y[:, 1, :, cdim:]              # bottom-right

    m = jnp.maximum(jnp.maximum(a, b), jnp.maximum(c, d))

    # First-occurrence (row-major window order) tie-break; NaNs fall through
    # to the last tap (documented deviation from PyTorch; fine for finite x).
    off = jnp.where(a == m, 0,
          jnp.where(b == m, 1,
          jnp.where(c == m, w_full, w_full + 1))).astype(jnp.int32)

    hh = (pl.program_id(1) * tile_hh
          + jax.lax.broadcasted_iota(jnp.int32, m.shape, 0))
    ww = jax.lax.broadcasted_iota(jnp.int32, m.shape, 1)
    base = (2 * hh) * w_full + 2 * ww

    out_ref[0] = m
    idx_ref[0] = base + off


# ----------------------------------------------------------------------------
# Wrappers (plain-JAX glue around the Pallas kernels)
# ----------------------------------------------------------------------------
def _im2col(x_nhwc):
    """3x3 / stride-1 / pad-1 im2col in bf16 (XLA glue).

    TODO(synk): an in-kernel 9-tap halo accumulation (memory_space=pl.ANY +
    make_async_copy of the halo window) would avoid materializing the 9x patch
    matrix in HBM entirely; the +/-1 row/col shifts are not expressible with
    Blocked index_maps, so this remains the one structural HBM-traffic TODO.
    """
    n, h, w, c = x_nhwc.shape
    xb = x_nhwc.astype(jnp.bfloat16)          # no-op for bf16 activations
    xp = jnp.pad(xb, ((0, 0), (1, 1), (1, 1), (0, 0)))
    cols = [xp[:, ky:ky + h, kx:kx + w, :] for ky in range(3) for kx in range(3)]
    return jnp.concatenate(cols, axis=-1).reshape(n * h * w, 9 * c)


def convblock_forward(x_nhwc, w, gamma, beta, *, fuse_into_pool=False):
    """One ConvBlock = Conv2d(3x3,s1,p1) + BatchNorm2d(training) + ReLU.

    fuse_into_pool=False -> returns the (N,H,W,Cout) bf16 activation.
    fuse_into_pool=True  -> returns ((N,H,W,CP) bf16 raw conv, scale, shift)
                            for the fused BN+ReLU+maxpool kernel.
    """
    N, H, W, Cin = x_nhwc.shape
    Cout = w.shape[0]
    CP = _round_up(max(Cout, LANES), LANES)
    K = 9 * Cin
    M = N * H * W
    TILE_M, M_pad = _choose_m_tiling(M)
    T = M_pad // TILE_M

    patches = _im2col(x_nhwc)
    if M_pad > M:
        patches = jnp.pad(patches, ((0, M_pad - M), (0, 0)))  # zero rows: BN-safe

    # (Cout, Cin, ky, kx) -> (ky, kx, Cin, Cout) -> (9*Cin, Cout) -> pad lanes.
    w2d = jnp.transpose(w, (2, 3, 1, 0)).reshape(K, Cout)
    w2d = jnp.pad(w2d, ((0, 0), (0, CP - Cout))).astype(jnp.bfloat16)

    stats_shape = jax.ShapeDtypeStruct((T * 8, CP), jnp.float32)
    stats_spec = pl.BlockSpec((8, CP), lambda i: (i, 0))
    patches_spec = pl.BlockSpec((TILE_M, K), lambda i: (i, 0))
    w_spec = pl.BlockSpec((K, CP), lambda i: (0, 0))          # resident weights
    mosaic = pltpu.CompilerParams(dimension_semantics=("parallel",),
                                  vmem_limit_bytes=VMEM_LIMIT_BYTES)

    # --- pass 1: tiled GEMM -> per-tile BN partial stats (+ bf16 conv if last)
    if fuse_into_pool:
        conv, stats = pl.pallas_call(
            conv_stats_store_kernel,
            out_shape=(jax.ShapeDtypeStruct((M_pad, CP), jnp.bfloat16),
                       stats_shape),
            grid=(T,),
            in_specs=[patches_spec, w_spec],
            out_specs=(pl.BlockSpec((TILE_M, CP), lambda i: (i, 0)), stats_spec),
            compiler_params=mosaic,
        )(patches, w2d)
    else:
        conv = None
        stats = pl.pallas_call(
            conv_stats_kernel,
            out_shape=stats_shape,
            grid=(T,),
            in_specs=[patches_spec, w_spec],
            out_specs=stats_spec,
            compiler_params=mosaic,
        )(patches, w2d)

    # --- fold training-mode BN (biased var) into a per-channel affine (tiny) -
    st = stats.reshape(T, 8, CP)
    mean = jnp.sum(st[:, 0, :], axis=0) / M
    var = jnp.maximum(jnp.sum(st[:, 1, :], axis=0) / M - mean * mean, 0.0)
    gamma_p = jnp.pad(gamma.astype(jnp.float32), (0, CP - Cout))
    beta_p = jnp.pad(beta.astype(jnp.float32), (0, CP - Cout))
    scale = gamma_p * jax.lax.rsqrt(var + BN_EPS)
    shift = beta_p - mean * scale
    # NOTE: the Conv bias is intentionally NOT applied -- training-mode BN's
    # mean subtraction cancels a per-channel constant exactly (zero change).
    # NOTE: running_mean / running_var are not updated (forward-only kernel).

    if fuse_into_pool:
        if M_pad > M:
            conv = conv[:M]
        return conv.reshape(N, H, W, CP), scale, shift

    # --- pass 2: recompute GEMM, BN + ReLU, emit bf16 real channels ----------
    act = pl.pallas_call(
        conv_bn_relu_kernel,
        out_shape=jax.ShapeDtypeStruct((M_pad, Cout), jnp.bfloat16),
        grid=(T,),
        in_specs=[patches_spec, w_spec,
                  pl.BlockSpec((1, CP), lambda i: (0, 0)),
                  pl.BlockSpec((1, CP), lambda i: (0, 0))],
        out_specs=pl.BlockSpec((TILE_M, Cout), lambda i: (i, 0)),
        compiler_params=mosaic,
    )(patches, w2d, scale.reshape(1, CP), shift.reshape(1, CP))
    if M_pad > M:
        act = act[:M]
    return act.reshape(N, H, W, Cout)


def maxpool_bn_relu_forward(conv_nhwc, scale, shift):
    """conv_nhwc: (N,H,W,CP) bf16 raw conv (CP multiple of 128).

    Applies y = conv*scale + shift, ReLU, then a 2x2/stride-2 max pool with
    PyTorch-style flat H*W argmax indices.  Returns (pooled f32, idx int32),
    both still channel-padded to CP.
    """
    N, H, W, CP = conv_nhwc.shape
    Hh, Wh = H // 2, W // 2
    conv_nhwc = conv_nhwc[:, :2 * Hh, :2 * Wh, :]   # floor-mode crop (no-op if even)

    # Byte-budget-aware row tiling: keeps blocks well inside v7x's 64 MiB
    # physical VMEM even for large widths, instead of a fixed 64-row cap.
    row_bytes = 2 * Wh * 2 * CP * conv_nhwc.dtype.itemsize
    cap = max(1, POOL_BLOCK_BYTES // row_bytes)
    tile_hh = _largest_divisor_leq(Hh, cap)
    # TODO(synk): for prime Hh > cap this degrades to tile_hh=1; a pl.cdiv grid
    # with a masked tail tile (and a Wh split for very wide images) would fix it.

    # Copy-free reshape: pool-row phases -> axis 2, pool-col phases -> lanes
    # [0:CP] / [CP:2CP] of the last axis (everything stays lane-dense).
    x5 = conv_nhwc.reshape(N, Hh, 2, Wh, 2 * CP)
    scale2 = jnp.concatenate([scale, scale]).reshape(1, 2 * CP)
    shift2 = jnp.concatenate([shift, shift]).reshape(1, 2 * CP)

    out, idx = pl.pallas_call(
        bn_relu_pool_kernel,
        out_shape=(jax.ShapeDtypeStruct((N, Hh, Wh, CP), jnp.float32),
                   jax.ShapeDtypeStruct((N, Hh, Wh, CP), jnp.int32)),
        grid=(N, Hh // tile_hh),
        in_specs=[pl.BlockSpec((1, tile_hh, 2, Wh, 2 * CP),
                               lambda n, t: (n, t, 0, 0, 0)),
                  pl.BlockSpec((1, 2 * CP), lambda n, t: (0, 0)),
                  pl.BlockSpec((1, 2 * CP), lambda n, t: (0, 0))],
        out_specs=(pl.BlockSpec((1, tile_hh, Wh, CP), lambda n, t: (n, t, 0, 0)),
                   pl.BlockSpec((1, tile_hh, Wh, CP), lambda n, t: (n, t, 0, 0))),
        compiler_params=pltpu.CompilerParams(
            dimension_semantics=("parallel", "parallel"),
            vmem_limit_bytes=VMEM_LIMIT_BYTES),
    )(x5, scale2, shift2)
    return out, idx


def init_encoder_params(key, in_channels, out_channels):
    params = []
    cin = in_channels
    for cout in out_channels:
        key, kw, kb, kg, kbe = jax.random.split(key, 5)
        fan_in = cin * 9
        w = jax.random.normal(kw, (cout, cin, 3, 3), jnp.float32) / jnp.sqrt(fan_in)
        # Conv bias kept for parameter parity with nn.Conv2d but unused in the
        # forward pass (training-mode BatchNorm cancels it exactly).
        b = 0.1 * jax.random.normal(kb, (cout,), jnp.float32)
        gamma = 1.0 + 0.1 * jax.random.normal(kg, (cout,), jnp.float32)
        beta = 0.1 * jax.random.normal(kbe, (cout,), jnp.float32)
        params.append({"w": w, "b": b, "gamma": gamma, "beta": beta})
        cin = cout
    return params


@jax.jit
def _encoder_impl(x_nchw, params):
    h = jnp.transpose(x_nchw, (0, 2, 3, 1)).astype(jnp.float32)
    for p in params[:-1]:
        h = convblock_forward(h, p["w"], p["gamma"], p["beta"])
    p_last = params[-1]
    conv, scale, shift = convblock_forward(h, p_last["w"], p_last["gamma"],
                                           p_last["beta"], fuse_into_pool=True)
    pooled, idx = maxpool_bn_relu_forward(conv, scale, shift)
    c_real = p_last["w"].shape[0]
    out_nchw = jnp.transpose(pooled[..., :c_real], (0, 3, 1, 2))
    idx_nchw = jnp.transpose(idx[..., :c_real], (0, 3, 1, 2))
    return out_nchw, idx_nchw


def encoder_forward(x_nchw, params):
    """Mirrors Encoder.forward: ConvBlocks -> max_pool2d(2,2,return_indices).

    Returns (out_nchw, cache) with cache = {'idx': idx_nchw (int32), 'dim': x.shape}.
    """
    out, idx = _encoder_impl(x_nchw, params)
    return out, {"idx": idx, "dim": x_nchw.shape}


if __name__ == "__main__":
    key = jax.random.PRNGKey(0)
    key, kx = jax.random.split(key)

    in_channels = 4
    out_channels = [8, 16]
    N, H, W = 2, 16, 16

    x = jax.random.normal(kx, (N, in_channels, H, W), jnp.float32)  # NCHW
    params = init_encoder_params(key, in_channels, out_channels)

    out, cache = encoder_forward(x, params)
    out = jax.block_until_ready(out)
    idx = jax.block_until_ready(cache["idx"])

    assert out.shape == (N, out_channels[-1], H // 2, W // 2)
    assert idx.shape == (N, out_channels[-1], H // 2, W // 2)
    assert cache["dim"] == x.shape
    assert bool(jnp.all(idx >= 0)) and bool(jnp.all(idx < H * W))

    print("KERNEL_OK")
</pallas_src>

<mosaic_0001>
module attributes {stable_mosaic.version = 11 : i64} {
  func.func @conv_stats_kernel(%arg0: i32, %arg1: memref<256x36xbf16, #tpu.memory_space<vmem>>, %arg2: memref<36x128xbf16, #tpu.memory_space<vmem>>, %arg3: memref<8x128xf32, #tpu.memory_space<vmem>>) attributes {dimension_semantics = [#tpu.dimension_semantics<parallel>], iteration_bounds = array<i64: 2>, scalar_prefetch = 0 : i64, scratch_operands = 0 : i64, tpu.core_type = #tpu.core_type<tc>, window_params = [{transform_indices = @transform_0, window_bounds = array<i64: 256, 36>}, {pipeline_mode = #tpu.pipeline_mode<synchronous>, transform_indices = @transform_1, window_bounds = array<i64: 36, 128>}, {transform_indices = @transform_2, window_bounds = array<i64: 8, 128>}]} {
    %cst = arith.constant 0.000000e+00 : f32
    %0 = vector.broadcast %cst : f32 to vector<8x128xf32>
    %c0 = arith.constant 0 : index
    %c0_0 = arith.constant 0 : index
    %1 = vector.load %arg3[%c0, %c0_0] : memref<8x128xf32, #tpu.memory_space<vmem>>, vector<8x128xf32>
    tpu.vector_store %arg3[%c0, %c0_0], %0 {strides = array<i32>} : memref<8x128xf32, #tpu.memory_space<vmem>>, vector<8x128xf32>,
    %c0_i32 = arith.constant 0 : i32
    %c1_i32 = arith.constant 1 : i32
    %2 = arith.muli %c0_i32, %c1_i32 : i32
    %c0_i32_1 = arith.constant 0 : i32
    %3 = arith.addi %c0_i32_1, %2 : i32
    %c256_i32 = arith.constant 256 : i32
    %4 = arith.muli %3, %c256_i32 : i32
    %5 = tpu.assume_multiple %4, 256 : i32
    %6 = arith.index_cast %5 : i32 to index
    %c0_2 = arith.constant 0 : index
    %7 = vector.load %arg1[%6, %c0_2] : memref<256x36xbf16, #tpu.memory_space<vmem>>, vector<256x36xbf16>
    %c0_3 = arith.constant 0 : index
    %c0_4 = arith.constant 0 : index
    %8 = vector.load %arg2[%c0_3, %c0_4] : memref<36x128xbf16, #tpu.memory_space<vmem>>, vector<36x128xbf16>
    %cst_5 = arith.constant dense<0.000000e+00> : vector<256x128xf32>
    %9 = tpu.matmul %7, %8, %cst_5 {dimension_numbers = #tpu.dot_dimension_numbers<[1], [0], [0], [1], [0, 0, 1, 1], [], []>} : vector<256x36xbf16>, vector<36x128xbf16>, vector<256x128xf32> -> vector<256x128xf32>
    %c0_6 = arith.constant 0 : index
    %c0_7 = arith.constant 0 : index
    %10 = vector.load %arg3[%c0_6, %c0_7] : memref<8x128xf32, #tpu.memory_space<vmem>>, vector<1x128xf32>
    %cst_8 = arith.constant dense<0.000000e+00> : vector<128xf32>
    %11 = vector.multi_reduction <add>, %9, %cst_8 [0] : vector<256x128xf32> to vector<128xf32>
    %12 = vector.shape_cast %11 : vector<128xf32> to vector<1x128xf32>
    %13 = arith.addf %10, %12 : vector<1x128xf32>
    %c0_9 = arith.constant 0 : index
    %c0_10 = arith.constant 0 : index
    %14 = vector.load %arg3[%c0_9, %c0_10] : memref<8x128xf32, #tpu.memory_space<vmem>>, vector<1x128xf32>
    tpu.vector_store %arg3[%c0_9, %c0_10], %13 {strides = array<i32>} : memref<8x128xf32, #tpu.memory_space<vmem>>, vector<1x128xf32>,
    %c1 = arith.constant 1 : index
    %c0_11 = arith.constant 0 : index
    %15 = vector.load %arg3[%c1, %c0_11] : memref<8x128xf32, #tpu.memory_space<vmem>>, vector<1x128xf32>
    %16 = arith.mulf %9, %9 : vector<256x128xf32>
    %cst_12 = arith.constant dense<0.000000e+00> : vector<128xf32>
    %17 = vector.multi_reduction <add>, %16, %cst_12 [0] : vector<256x128xf32> to vector<128xf32>
    %18 = vector.shape_cast %17 : vector<128xf32> to vector<1x128xf32>
    %19 = arith.addf %15, %18 : vector<1x128xf32>
    %c1_13 = arith.constant 1 : index
    %c0_14 = arith.constant 0 : index
    %20 = vector.load %arg3[%c1_13, %c0_14] : memref<8x128xf32, #tpu.memory_space<vmem>>, vector<1x128xf32>
    tpu.vector_store %arg3[%c1_13, %c0_14], %19 {strides = array<i32>} : memref<8x128xf32, #tpu.memory_space<vmem>>, vector<1x128xf32>,
    %c1_i32_15 = arith.constant 1 : i32
    return
  }
  func.func @transform_0(%arg0: i32) -> (i32, i32) {
    %c0_i32 = arith.constant 0 : i32
    %c0_i32_0 = arith.constant 0 : i32
    return %arg0, %c0_i32 : i32, i32
  }
  func.func @transform_1(%arg0: i32) -> (i32, i32) {
    %c0_i32 = arith.constant 0 : i32
    %c0_i32_0 = arith.constant 0 : i32
    %c0_i32_1 = arith.constant 0 : i32
    return %c0_i32, %c0_i32_0 : i32, i32
  }
  func.func @transform_2(%arg0: i32) -> (i32, i32) {
    %c0_i32 = arith.constant 0 : i32
    %c0_i32_0 = arith.constant 0 : i32
    return %arg0, %c0_i32 : i32, i32
  }
}

module attributes {stable_mosaic.version = 11 : i64} {
  func.func @conv_bn_relu_kernel(%arg0: i32, %arg1: memref<256x36xbf16, #tpu.memory_space<vmem>>, %arg2: memref<36x128xbf16, #tpu.memory_space<vmem>>, %arg3: memref<1x128xf32, #tpu.memory_space<vmem>>, %arg4: memref<1x128xf32, #tpu.memory_space<vmem>>, %arg5: memref<256x8xbf16, #tpu.memory_space<vmem>>) attributes {dimension_semantics = [#tpu.dimension_semantics<parallel>], iteration_bounds = array<i64: 2>, scalar_prefetch = 0 : i64, scratch_operands = 0 : i64, tpu.core_type = #tpu.core_type<tc>, window_params = [{transform_indices = @transform_0, window_bounds = array<i64: 256, 36>}, {pipeline_mode = #tpu.pipeline_mode<synchronous>, transform_indices = @transform_1, window_bounds = array<i64: 36, 128>}, {pipeline_mode = #tpu.pipeline_mode<synchronous>, transform_indices = @transform_2, window_bounds = array<i64: 1, 128>}, {pipeline_mode = #tpu.pipeline_mode<synchronous>, transform_indices = @transform_3, window_bounds = array<i64: 1, 128>}, {transform_indices = @transform_4, window_bounds = array<i64: 256, 8>}]} {
    %c0_i32 = arith.constant 0 : i32
    %c1_i32 = arith.constant 1 : i32
    %0 = arith.muli %c0_i32, %c1_i32 : i32
    %c0_i32_0 = arith.constant 0 : i32
    %1 = arith.addi %c0_i32_0, %0 : i32
    %c256_i32 = arith.constant 256 : i32
    %2 = arith.muli %1, %c256_i32 : i32
    %3 = tpu.assume_multiple %2, 256 : i32
    %4 = arith.index_cast %3 : i32 to index
    %c0 = arith.constant 0 : index
    %5 = vector.load %arg1[%4, %c0] : memref<256x36xbf16, #tpu.memory_space<vmem>>, vector<256x36xbf16>
    %c0_1 = arith.constant 0 : index
    %c0_2 = arith.constant 0 : index
    %6 = vector.load %arg2[%c0_1, %c0_2] : memref<36x128xbf16, #tpu.memory_space<vmem>>, vector<36x128xbf16>
    %cst = arith.constant dense<0.000000e+00> : vector<256x128xf32>
    %7 = tpu.matmul %5, %6, %cst {dimension_numbers = #tpu.dot_dimension_numbers<[1], [0], [0], [1], [0, 0, 1, 1], [], []>} : vector<256x36xbf16>, vector<36x128xbf16>, vector<256x128xf32> -> vector<256x128xf32>
    %c0_3 = arith.constant 0 : index
    %c0_4 = arith.constant 0 : index
    %8 = vector.load %arg3[%c0_3, %c0_4] : memref<1x128xf32, #tpu.memory_space<vmem>>, vector<1x128xf32>
    %9 = vector.broadcast %8 : vector<1x128xf32> to vector<256x128xf32>
    %10 = arith.mulf %7, %9 : vector<256x128xf32>
    %c0_5 = arith.constant 0 : index
    %c0_6 = arith.constant 0 : index
    %11 = vector.load %arg4[%c0_5, %c0_6] : memref<1x128xf32, #tpu.memory_space<vmem>>, vector<1x128xf32>
    %12 = vector.broadcast %11 : vector<1x128xf32> to vector<256x128xf32>
    %13 = arith.addf %10, %12 : vector<256x128xf32>
    %cst_7 = arith.constant 0.000000e+00 : f32
    %14 = vector.broadcast %cst_7 : f32 to vector<256x128xf32>
    %15 = arith.maximumf %13, %14 : vector<256x128xf32>
    %16 = vector.extract_strided_slice %15 {offsets = [0, 0], sizes = [256, 8], strides = [1, 1]} : vector<256x128xf32> to vector<256x8xf32>
    %17 = arith.truncf %16 : vector<256x8xf32> to vector<256x8xbf16>
    %18 = arith.index_cast %3 : i32 to index
    %c0_8 = arith.constant 0 : index
    %19 = vector.load %arg5[%18, %c0_8] : memref<256x8xbf16, #tpu.memory_space<vmem>>, vector<256x8xbf16>
    tpu.vector_store %arg5[%18, %c0_8], %17 {strides = array<i32>} : memref<256x8xbf16, #tpu.memory_space<vmem>>, vector<256x8xbf16>,
    %c1_i32_9 = arith.constant 1 : i32
    return
  }
  func.func @transform_0(%arg0: i32) -> (i32, i32) {
    %c0_i32 = arith.constant 0 : i32
    %c0_i32_0 = arith.constant 0 : i32
    return %arg0, %c0_i32 : i32, i32
  }
  func.func @transform_1(%arg0: i32) -> (i32, i32) {
    %c0_i32 = arith.constant 0 : i32
    %c0_i32_0 = arith.constant 0 : i32
    %c0_i32_1 = arith.constant 0 : i32
    return %c0_i32, %c0_i32_0 : i32, i32
  }
  func.func @transform_2(%arg0: i32) -> (i32, i32) {
    %c0_i32 = arith.constant 0 : i32
    %c0_i32_0 = arith.constant 0 : i32
    %c0_i32_1 = arith.constant 0 : i32
    return %c0_i32, %c0_i32_0 : i32, i32
  }
  func.func @transform_3(%arg0: i32) -> (i32, i32) {
    %c0_i32 = arith.constant 0 : i32
    %c0_i32_0 = arith.constant 0 : i32
    %c0_i32_1 = arith.constant 0 : i32
    return %c0_i32, %c0_i32_0 : i32, i32
  }
  func.func @transform_4(%arg0: i32) -> (i32, i32) {
    %c0_i32 = arith.constant 0 : i32
    %c0_i32_0 = arith.constant 0 : i32
    return %arg0, %c0_i32 : i32, i32
  }
}

module attributes {stable_mosaic.version = 11 : i64} {
  func.func @conv_stats_store_kernel(%arg0: i32, %arg1: memref<256x72xbf16, #tpu.memory_space<vmem>>, %arg2: memref<72x128xbf16, #tpu.memory_space<vmem>>, %arg3: memref<256x128xbf16, #tpu.memory_space<vmem>>, %arg4: memref<8x128xf32, #tpu.memory_space<vmem>>) attributes {dimension_semantics = [#tpu.dimension_semantics<parallel>], iteration_bounds = array<i64: 2>, scalar_prefetch = 0 : i64, scratch_operands = 0 : i64, tpu.core_type = #tpu.core_type<tc>, window_params = [{transform_indices = @transform_0, window_bounds = array<i64: 256, 72>}, {pipeline_mode = #tpu.pipeline_mode<synchronous>, transform_indices = @transform_1, window_bounds = array<i64: 72, 128>}, {transform_indices = @transform_2, window_bounds = array<i64: 256, 128>}, {transform_indices = @transform_3, window_bounds = array<i64: 8, 128>}]} {
    %cst = arith.constant 0.000000e+00 : f32
    %0 = vector.broadcast %cst : f32 to vector<8x128xf32>
    %c0 = arith.constant 0 : index
    %c0_0 = arith.constant 0 : index
    %1 = vector.load %arg4[%c0, %c0_0] : memref<8x128xf32, #tpu.memory_space<vmem>>, vector<8x128xf32>
    tpu.vector_store %arg4[%c0, %c0_0], %0 {strides = array<i32>} : memref<8x128xf32, #tpu.memory_space<vmem>>, vector<8x128xf32>,
    %c0_i32 = arith.constant 0 : i32
    %c1_i32 = arith.constant 1 : i32
    %2 = arith.muli %c0_i32, %c1_i32 : i32
    %c0_i32_1 = arith.constant 0 : i32
    %3 = arith.addi %c0_i32_1, %2 : i32
    %c256_i32 = arith.constant 256 : i32
    %4 = arith.muli %3, %c256_i32 : i32
    %5 = tpu.assume_multiple %4, 256 : i32
    %6 = arith.index_cast %5 : i32 to index
    %c0_2 = arith.constant 0 : index
    %7 = vector.load %arg1[%6, %c0_2] : memref<256x72xbf16, #tpu.memory_space<vmem>>, vector<256x72xbf16>
    %c0_3 = arith.constant 0 : index
    %c0_4 = arith.constant 0 : index
    %8 = vector.load %arg2[%c0_3, %c0_4] : memref<72x128xbf16, #tpu.memory_space<vmem>>, vector<72x128xbf16>
    %cst_5 = arith.constant dense<0.000000e+00> : vector<256x128xf32>
    %9 = tpu.matmul %7, %8, %cst_5 {dimension_numbers = #tpu.dot_dimension_numbers<[1], [0], [0], [1], [0, 0, 1, 1], [], []>} : vector<256x72xbf16>, vector<72x128xbf16>, vector<256x128xf32> -> vector<256x128xf32>
    %10 = arith.truncf %9 : vector<256x128xf32> to vector<256x128xbf16>
    %11 = arith.index_cast %5 : i32 to index
    %c0_6 = arith.constant 0 : index
    %12 = vector.load %arg3[%11, %c0_6] : memref<256x128xbf16, #tpu.memory_space<vmem>>, vector<256x128xbf16>
    tpu.vector_store %arg3[%11, %c0_6], %10 {strides = array<i32>} : memref<256x128xbf16, #tpu.memory_space<vmem>>, vector<256x128xbf16>,
    %c0_7 = arith.constant 0 : index
    %c0_8 = arith.constant 0 : index
    %13 = vector.load %arg4[%c0_7, %c0_8] : memref<8x128xf32, #tpu.memory_space<vmem>>, vector<1x128xf32>
    %cst_9 = arith.constant dense<0.000000e+00> : vector<128xf32>
    %14 = vector.multi_reduction <add>, %9, %cst_9 [0] : vector<256x128xf32> to vector<128xf32>
    %15 = vector.shape_cast %14 : vector<128xf32> to vector<1x128xf32>
    %16 = arith.addf %13, %15 : vector<1x128xf32>
    %c0_10 = arith.constant 0 : index
    %c0_11 = arith.constant 0 : index
    %17 = vector.load %arg4[%c0_10, %c0_11] : memref<8x128xf32, #tpu.memory_space<vmem>>, vector<1x128xf32>
    tpu.vector_store %arg4[%c0_10, %c0_11], %16 {strides = array<i32>} : memref<8x128xf32, #tpu.memory_space<vmem>>, vector<1x128xf32>,
    %c1 = arith.constant 1 : index
    %c0_12 = arith.constant 0 : index
    %18 = vector.load %arg4[%c1, %c0_12] : memref<8x128xf32, #tpu.memory_space<vmem>>, vector<1x128xf32>
    %19 = arith.mulf %9, %9 : vector<256x128xf32>
    %cst_13 = arith.constant dense<0.000000e+00> : vector<128xf32>
    %20 = vector.multi_reduction <add>, %19, %cst_13 [0] : vector<256x128xf32> to vector<128xf32>
    %21 = vector.shape_cast %20 : vector<128xf32> to vector<1x128xf32>
    %22 = arith.addf %18, %21 : vector<1x128xf32>
    %c1_14 = arith.constant 1 : index
    %c0_15 = arith.constant 0 : index
    %23 = vector.load %arg4[%c1_14, %c0_15] : memref<8x128xf32, #tpu.memory_space<vmem>>, vector<1x128xf32>
    tpu.vector_store %arg4[%c1_14, %c0_15], %22 {strides = array<i32>} : memref<8x128xf32, #tpu.memory_space<vmem>>, vector<1x128xf32>,
    %c1_i32_16 = arith.constant 1 : i32
    return
  }
  func.func @transform_0(%arg0: i32) -> (i32, i32) {
    %c0_i32 = arith.constant 0 : i32
    %c0_i32_0 = arith.constant 0 : i32
    return %arg0, %c0_i32 : i32, i32
  }
  func.func @transform_1(%arg0: i32) -> (i32, i32) {
    %c0_i32 = arith.constant 0 : i32
    %c0_i32_0 = arith.constant 0 : i32
    %c0_i32_1 = arith.constant 0 : i32
    return %c0_i32, %c0_i32_0 : i32, i32
  }
  func.func @transform_2(%arg0: i32) -> (i32, i32) {
    %c0_i32 = arith.constant 0 : i32
    %c0_i32_0 = arith.constant 0 : i32
    return %arg0, %c0_i32 : i32, i32
  }
  func.func @transform_3(%arg0: i32) -> (i32, i32) {
    %c0_i32 = arith.constant 0 : i32
    %c0_i32_0 = arith.constant 0 : i32
    return %arg0, %c0_i32 : i32, i32
  }
}

module attributes {stable_mosaic.version = 11 : i64} {
  func.func @bn_relu_pool_kernel(%arg0: i32, %arg1: i32, %arg2: memref<1x8x2x8x256xbf16, #tpu.memory_space<vmem>>, %arg3: memref<1x256xf32, #tpu.memory_space<vmem>>, %arg4: memref<1x256xf32, #tpu.memory_space<vmem>>, %arg5: memref<1x8x8x128xf32, #tpu.memory_space<vmem>>, %arg6: memref<1x8x8x128xi32, #tpu.memory_space<vmem>>) attributes {dimension_semantics = [#tpu.dimension_semantics<parallel>, #tpu.dimension_semantics<parallel>], iteration_bounds = array<i64: 2, 1>, scalar_prefetch = 0 : i64, scratch_operands = 0 : i64, tpu.core_type = #tpu.core_type<tc>, window_params = [{transform_indices = @transform_0, window_bounds = array<i64: 1, 8, 2, 8, 256>}, {pipeline_mode = #tpu.pipeline_mode<synchronous>, transform_indices = @transform_1, window_bounds = array<i64: 1, 256>}, {pipeline_mode = #tpu.pipeline_mode<synchronous>, transform_indices = @transform_2, window_bounds = array<i64: 1, 256>}, {transform_indices = @transform_3, window_bounds = array<i64: 1, 8, 8, 128>}, {transform_indices = @transform_4, window_bounds = array<i64: 1, 8, 8, 128>}]} {
    %c0 = arith.constant 0 : index
    %c0_0 = arith.constant 0 : index
    %c0_1 = arith.constant 0 : index
    %c0_2 = arith.constant 0 : index
    %c0_3 = arith.constant 0 : index
    %0 = vector.load %arg2[%c0, %c0_0, %c0_1, %c0_2, %c0_3] : memref<1x8x2x8x256xbf16, #tpu.memory_space<vmem>>, vector<1x8x2x8x256xbf16>
    %1 = vector.shape_cast %0 : vector<1x8x2x8x256xbf16> to vector<8x2x8x256xbf16>
    %2 = arith.extf %1 : vector<8x2x8x256xbf16> to vector<8x2x8x256xf32>
    %c0_4 = arith.constant 0 : index
    %c0_5 = arith.constant 0 : index
    %3 = vector.load %arg3[%c0_4, %c0_5] : memref<1x256xf32, #tpu.memory_space<vmem>>, vector<1x256xf32>
    %4 = vector.shape_cast %3 : vector<1x256xf32> to vector<1x1x1x256xf32>
    %5 = vector.broadcast %4 : vector<1x1x1x256xf32> to vector<8x2x8x256xf32>
    %6 = arith.mulf %2, %5 : vector<8x2x8x256xf32>
    %c0_6 = arith.constant 0 : index
    %c0_7 = arith.constant 0 : index
    %7 = vector.load %arg4[%c0_6, %c0_7] : memref<1x256xf32, #tpu.memory_space<vmem>>, vector<1x256xf32>
    %8 = vector.shape_cast %7 : vector<1x256xf32> to vector<1x1x1x256xf32>
    %9 = vector.broadcast %8 : vector<1x1x1x256xf32> to vector<8x2x8x256xf32>
    %10 = arith.addf %6, %9 : vector<8x2x8x256xf32>
    %cst = arith.constant 0.000000e+00 : f32
    %11 = vector.broadcast %cst : f32 to vector<8x2x8x256xf32>
    %12 = arith.maximumf %10, %11 : vector<8x2x8x256xf32>
    %13 = vector.extract_strided_slice %12 {offsets = [0, 0, 0, 0], sizes = [8, 1, 8, 128], strides = [1, 1, 1, 1]} : vector<8x2x8x256xf32> to vector<8x1x8x128xf32>
    %14 = vector.shape_cast %13 : vector<8x1x8x128xf32> to vector<8x8x128xf32>
    %15 = vector.extract_strided_slice %12 {offsets = [0, 0, 0, 128], sizes = [8, 1, 8, 128], strides = [1, 1, 1, 1]} : vector<8x2x8x256xf32> to vector<8x1x8x128xf32>
    %16 = vector.shape_cast %15 : vector<8x1x8x128xf32> to vector<8x8x128xf32>
    %17 = vector.extract_strided_slice %12 {offsets = [0, 1, 0, 0], sizes = [8, 1, 8, 128], strides = [1, 1, 1, 1]} : vector<8x2x8x256xf32> to vector<8x1x8x128xf32>
    %18 = vector.shape_cast %17 : vector<8x1x8x128xf32> to vector<8x8x128xf32>
    %19 = vector.extract_strided_slice %12 {offsets = [0, 1, 0, 128], sizes = [8, 1, 8, 128], strides = [1, 1, 1, 1]} : vector<8x2x8x256xf32> to vector<8x1x8x128xf32>
    %20 = vector.shape_cast %19 : vector<8x1x8x128xf32> to vector<8x8x128xf32>
    %21 = arith.maximumf %14, %16 : vector<8x8x128xf32>
    %22 = arith.maximumf %18, %20 : vector<8x8x128xf32>
    %23 = arith.maximumf %21, %22 : vector<8x8x128xf32>
    %24 = arith.cmpf oeq, %14, %23 : vector<8x8x128xf32>
    %25 = arith.cmpf oeq, %16, %23 : vector<8x8x128xf32>
    %26 = arith.cmpf oeq, %18, %23 : vector<8x8x128xf32>
    %c16_i32 = arith.constant 16 : i32
    %c17_i32 = arith.constant 17 : i32
    %27 = vector.broadcast %c16_i32 : i32 to vector<8x8x128xi32>
    %28 = vector.broadcast %c17_i32 : i32 to vector<8x8x128xi32>
    %29 = arith.select %26, %27, %28 : vector<8x8x128xi1>, vector<8x8x128xi32>
    %c1_i32 = arith.constant 1 : i32
    %30 = vector.broadcast %c1_i32 : i32 to vector<8x8x128xi32>
    %31 = arith.select %25, %30, %29 : vector<8x8x128xi1>, vector<8x8x128xi32>
    %c0_i32 = arith.constant 0 : i32
    %32 = vector.broadcast %c0_i32 : i32 to vector<8x8x128xi32>
    %33 = arith.select %24, %32, %31 : vector<8x8x128xi1>, vector<8x8x128xi32>
    %c8_i32 = arith.constant 8 : i32
    %34 = arith.muli %arg1, %c8_i32 : i32
    %35 = tpu.iota {dimensions = array<i32: 0>} : vector<8x8x128xi32>
    %36 = vector.broadcast %34 : i32 to vector<8x8x128xi32>
    %37 = arith.addi %36, %35 : vector<8x8x128xi32>
    %38 = tpu.iota {dimensions = array<i32: 1>} : vector<8x8x128xi32>
    %c2_i32 = arith.constant 2 : i32
    %39 = vector.broadcast %c2_i32 : i32 to vector<8x8x128xi32>
    %40 = arith.muli %39, %37 : vector<8x8x128xi32>
    %c16_i32_8 = arith.constant 16 : i32
    %41 = vector.broadcast %c16_i32_8 : i32 to vector<8x8x128xi32>
    %42 = arith.muli %40, %41 : vector<8x8x128xi32>
    %c2_i32_9 = arith.constant 2 : i32
    %43 = vector.broadcast %c2_i32_9 : i32 to vector<8x8x128xi32>
    %44 = arith.muli %43, %38 : vector<8x8x128xi32>
    %45 = arith.addi %42, %44 : vector<8x8x128xi32>
    %c0_10 = arith.constant 0 : index
    %c0_11 = arith.constant 0 : index
    %c0_12 = arith.constant 0 : index
    %c0_13 = arith.constant 0 : index
    %46 = vector.load %arg5[%c0_10, %c0_11, %c0_12, %c0_13] : memref<1x8x8x128xf32, #tpu.memory_space<vmem>>, vector<1x8x8x128xf32>
    %47 = vector.shape_cast %46 : vector<1x8x8x128xf32> to vector<8x8x128xf32>
    %48 = vector.shape_cast %23 : vector<8x8x128xf32> to vector<1x8x8x128xf32>
    tpu.vector_store %arg5[%c0_10, %c0_11, %c0_12, %c0_13], %48 {strides = array<i32>} : memref<1x8x8x128xf32, #tpu.memory_space<vmem>>, vector<1x8x8x128xf32>,
    %49 = arith.addi %45, %33 : vector<8x8x128xi32>
    %c0_14 = arith.constant 0 : index
    %c0_15 = arith.constant 0 : index
    %c0_16 = arith.constant 0 : index
    %c0_17 = arith.constant 0 : index
    %50 = vector.load %arg6[%c0_14, %c0_15, %c0_16, %c0_17] : memref<1x8x8x128xi32, #tpu.memory_space<vmem>>, vector<1x8x8x128xi32>
    %51 = vector.shape_cast %50 : vector<1x8x8x128xi32> to vector<8x8x128xi32>
    %52 = vector.shape_cast %49 : vector<8x8x128xi32> to vector<1x8x8x128xi32>
    tpu.vector_store %arg6[%c0_14, %c0_15, %c0_16, %c0_17], %52 {strides = array<i32>} : memref<1x8x8x128xi32, #tpu.memory_space<vmem>>, vector<1x8x8x128xi32>,
    return
  }
  func.func @transform_0(%arg0: i32, %arg1: i32) -> (i32, i32, i32, i32, i32) {
    %c0_i32 = arith.constant 0 : i32
    %c0_i32_0 = arith.constant 0 : i32
    %c0_i32_1 = arith.constant 0 : i32
    %c0_i32_2 = arith.constant 0 : i32
    return %arg0, %arg1, %c0_i32, %c0_i32_0, %c0_i32_1 : i32, i32, i32, i32, i32
  }
  func.func @transform_1(%arg0: i32, %arg1: i32) -> (i32, i32) {
    %c0_i32 = arith.constant 0 : i32
    %c0_i32_0 = arith.constant 0 : i32
    %c0_i32_1 = arith.constant 0 : i32
    return %c0_i32, %c0_i32_0 : i32, i32
  }
  func.func @transform_2(%arg0: i32, %arg1: i32) -> (i32, i32) {
    %c0_i32 = arith.constant 0 : i32
    %c0_i32_0 = arith.constant 0 : i32
    %c0_i32_1 = arith.constant 0 : i32
    return %c0_i32, %c0_i32_0 : i32, i32
  }
  func.func @transform_3(%arg0: i32, %arg1: i32) -> (i32, i32, i32, i32) {
    %c0_i32 = arith.constant 0 : i32
    %c0_i32_0 = arith.constant 0 : i32
    %c0_i32_1 = arith.constant 0 : i32
    return %arg0, %arg1, %c0_i32, %c0_i32_0 : i32, i32, i32, i32
  }
  func.func @transform_4(%arg0: i32, %arg1: i32) -> (i32, i32, i32, i32) {
    %c0_i32 = arith.constant 0 : i32
    %c0_i32_0 = arith.constant 0 : i32
    %c0_i32_1 = arith.constant 0 : i32
    return %arg0, %arg1, %c0_i32, %c0_i32_0 : i32, i32, i32, i32
  }
}

</mosaic_0001>

<bundles_post_ra>
// kernel: _encoder_impl.4
= control target key start
LH: loop header
LB: loop body
LE: loop exit
PB: predicated region body
PF: predicated region fallthrough
CT: control target
= control target key end

     0   :  { %s819_s9 = smov 0   ;;  %s921_s0 = inlined_call_operand.vmem [shape: bf16[512,36], index: 0, kind: input, shape index: {}]   ;;  %s922_s1 = inlined_call_operand.vmem [shape: bf16[36,128], index: 1, kind: input, shape index: {}]   ;;  %s923_s2 = inlined_call_operand.vmem [shape: f32[16,128], index: 2, kind: output, shape index: {}]  }
   0x1 LB: > { %s825_s10 = sadd.s32 4294967295, %s801_s9   ;;  %p661_p0 = scmp.ge.s32.totalorder %s801_s9, 1  ;;  %s801_s9 = sphi %s819_s9, %s12_s9  }
   0x2   : > { %p113_p1 = scmp.lt.s32.totalorder %s801_s9, 3 }
   0x4   : > { %p114_p2 = pnand %p661_p0, %p113_p1 }
   0x5   : > { %v776_v0 = vld [vmem:[%s922_s1] sm:$0xff] (!%p114_p2)   ;;  %v777_v1 = vld [vmem:[%s922_s1 + $0x8] sm:$0xff] (!%p114_p2)   ;;  %s662_s15 = sshll.u32 (!%p114_p2), %s825_s10, 5  ;;  %v778_v2 = vld [vmem:[%s922_s1 + $0x10] ss:$0 sps:$4 sm:$0x33] (!%p114_p2)  }
   0x6   : > { %117 = sbr.rel (%p114_p2) target bundleno = 312 (0x138), region = 28  ;;  %721 = vmatprep.subr.bf16.mxu0 (!%p114_p2), %v776_v0  ;;  %p135_p3 = scmp.lt.s32.totalorder (!%p114_p2), %s662_s15, 63  ;;  %759 = vmatprep.subr.bf16.mxu1 (!%p114_p2), %v776_v0  ;;  %vm327_vm0 = vcmask (!%p114_p2), 1041408   ;;  %vm278_vm1 = vcmask (!%p114_p2), 293888   ;;  %v803_v20 = vmov (!%p114_p2), 0.0  }
   0x7   : > { %722 = vmatpush3.bf16.msra.mxu0 (!%p114_p2), %v776_v0  ;;  %762 = vmatpush3.bf16.msra.mxu1 (!%p114_p2), %v776_v0  ;;  %v329_v3 = vsel (!%p114_p2), %vm327_vm0, %v778_v2, 0  ;;  %p140_p4 = scmp.lt.s32.totalorder (!%p114_p2), %s825_s10, 1 }
   0x8   : > { %723 = vmatprep.subr.bf16.mxu0 (!%p114_p2), %v777_v1  ;;  %760 = vmatprep.subr.bf16.mxu1 (!%p114_p2), %v777_v1 }
   0xb   : > { %724 = vmatpush3.bf16.msra.mxu0 (!%p114_p2), %v777_v1  ;;  %763 = vmatpush3.bf16.msra.mxu1 (!%p114_p2), %v777_v1 }
   0xc   : > { %765 = vmatprep.subr.msk.bf16.mxu0 (!%p114_p2), %vm327_vm0, %v778_v2  ;;  %766 = vmatprep.subr.msk.bf16.mxu1 (!%p114_p2), %vm327_vm0, %v778_v2 }
   0xd   : > { %s925_s15 = smov (!%p135_p3, %s662_s15), 63  ;;  %s927_s10 = smov (!%p140_p4, %s825_s10), 1 }
   0xe   : > { %s663_s18 = sshll.u32 %s925_s15, 2  ;;  %s664_s22 = sshll.u32 %s927_s10, 3 }
   0xf   : > { %s842_s21 = scalar_lea.vmem %s921_s0, %s663_s18  ;;  %726 = vmatpush3.bf16.msra.mxu0 %v329_v3  ;;  %764 = vmatpush3.bf16.msra.mxu1 %v329_v3  ;;  %s881_s25 = scalar_lea.vmem %s923_s2, %s664_s22 }
  0x10   : > { %v779_v4 = vld [vmem:[%s842_s21] sm:$0xff]   ;;  %v780_v5 = vld [vmem:[%s842_s21 + $0x8] sm:$0xff]   ;;  %v781_v6 = vld [vmem:[%s842_s21 + $0x10] sm:$0xff]   ;;  %145 = vst [vmem:[%s881_s25] sm:$0xff] %v803_v20 }
  0x11   : > { %727 = vmatprep.mubr.msk.bf16.mxu0 %vm278_vm1, %v779_v4  ;;  %v782_v7 = vld [vmem:[%s842_s21 + $0x18] sm:$0xff]   ;;  %v787_v8 = vld [vmem:[%s842_s21 + $0x40] sm:$0xff]   ;;  %v788_v9 = vld [vmem:[%s842_s21 + $0x48] sm:$0xff]  }
  0x12   : > { %728 = vmatmul.mubr.msk.bf16.vlgmr.msra.gmra.mrb[0].mxu0 %vm278_vm1, %v780_v5  ;;  %743 = vmatprep.mubr.msk.bf16.mxu1 %vm278_vm1, %v787_v8  ;;  %v789_v10 = vld [vmem:[%s842_s21 + $0x50] sm:$0xff]   ;;  %v783_v11 = vld [vmem:[%s842_s21 + $0x20] sm:$0xff]   ;;  %v790_v12 = vld [vmem:[%s842_s21 + $0x58] sm:$0xff]  }
  0x13   : > { %731 = vmatprep.mubr.msk.bf16.mxu0 %vm278_vm1, %v781_v6  ;;  %744 = vmatmul.mubr.msk.bf16.vlgmr.msra.gmra.mrb[0].mxu1 %vm278_vm1, %v788_v9  ;;  %v791_v13 = vld [vmem:[%s842_s21 + $0x60] sm:$0xff]   ;;  %v784_v14 = vld [vmem:[%s842_s21 + $0x28] sm:$0xff]   ;;  %v785_v15 = vld [vmem:[%s842_s21 + $0x30] sm:$0xff]  }
  0x14   : > { %747 = vmatprep.mubr.msk.bf16.mxu1 %vm278_vm1, %v789_v10  ;;  %v792_v16 = vld [vmem:[%s842_s21 + $0x68] sm:$0xff]   ;;  %v793_v17 = vld [vmem:[%s842_s21 + $0x70] sm:$0xff]   ;;  %v786_v18 = vld [vmem:[%s842_s21 + $0x38] sm:$0xff]  }
  0x15   : > { %v794_v19 = vld [vmem:[%s842_s21 + $0x78] sm:$0xff]  }
  0x1a   : > { %732 = vmatmul.mubr.msk.bf16.gmra.mrb[4].mxu0 %vm278_vm1, %v782_v7 }
  0x1b   : > { %735 = vmatprep.mubr.msk.bf16.mxu0 %vm278_vm1, %v783_v11  ;;  %748 = vmatmul.mubr.msk.bf16.gmra.mrb[4].mxu1 %vm278_vm1, %v790_v12 }
  0x1c   : > { %751 = vmatprep.mubr.msk.bf16.mxu1 %vm278_vm1, %v791_v13 }
  0x22   : > { %736 = vmatmul.mubr.msk.bf16.gmra.mrb[8].mxu0 %vm278_vm1, %v784_v14 }
  0x23   : > { %739 = vmatprep.mubr.msk.bf16.mxu0 %vm278_vm1, %v785_v15  ;;  %752 = vmatmul.mubr.msk.bf16.gmra.mrb[8].mxu1 %vm278_vm1, %v792_v16 }
  0x24   : > { %755 = vmatprep.mubr.msk.bf16.mxu1 %vm278_vm1, %v793_v17 }
  0x2a   : > { %740 = vmatmul.mubr.msk.bf16.gmra.mrb[12].mxu0 %vm278_vm1, %v786_v18 }
  0x2b   : > { %756 = vmatmul.mubr.msk.bf16.gmra.mrb[12].mxu1 %vm278_vm1, %v794_v19 }
  0xe5   : > { %v729_v21 = vpop.f32.mrb[0].mxu0 }
  0xe6   : > { %v365_v22 = vpop.f32.mrb[1].mxu0  ;;  %v884_v28 = vpop.f32.mrb[0].mxu1  ;;  %v535_v29 = vmul.f32 %v729_v21, %v729_v21 }
  0xe7   : > { %v730_v23 = vpop.f32.mrb[2].mxu0  ;;  %v533_v25 = vmul.f32 %v365_v22, %v365_v22  ;;  %v886_v32 = vpop.f32.mrb[1].mxu1 }
  0xe8   : > { %v368_v24 = vpop.f32.mrb[3].mxu0  ;;  %v888_v33 = vpop.f32.mrb[2].mxu1  ;;  %v536_v34 = vmul.f32 %v730_v23, %v730_v23 }
  0xe9   : > { %v493_v26 = vadd.f32 %v368_v24, %v365_v22  ;;  %v534_v27 = vmul.f32 %v368_v24, %v368_v24  ;;  %v890_v38 = vpop.f32.mrb[3].mxu1 }
  0xeb   : > { %v494_v30 = vadd.f32 %v729_v21, %v493_v26  ;;  %v565_v31 = vadd.f32 %v534_v27, %v533_v25 }
  0xed   : > { %v566_v35 = vadd.f32 %v565_v31, %v535_v29  ;;  %v733_v36 = vpop.f32.mrb[4].mxu0  ;;  %v495_v37 = vadd.f32 %v730_v23, %v494_v30 }
  0xee   : > { %v381_v39 = vpop.f32.mrb[5].mxu0  ;;  %v892_v48 = vpop.f32.mrb[4].mxu1  ;;  %v539_v49 = vmul.f32 %v733_v36, %v733_v36 }
  0xef   : > { %v496_v40 = vadd.f32 %v495_v37, %v381_v39  ;;  %v537_v41 = vmul.f32 %v381_v39, %v381_v39  ;;  %v567_v42 = vadd.f32 %v566_v35, %v536_v34  ;;  %v734_v43 = vpop.f32.mrb[6].mxu0  ;;  %v445_v52 = vpop.f32.mrb[5].mxu1 }
  0xf0   : > { %v384_v44 = vpop.f32.mrb[7].mxu0  ;;  %v894_v53 = vpop.f32.mrb[6].mxu1  ;;  %v540_v54 = vmul.f32 %v734_v43, %v734_v43 }
  0xf1   : > { %v568_v45 = vadd.f32 %v567_v42, %v537_v41  ;;  %v497_v46 = vadd.f32 %v496_v40, %v384_v44  ;;  %v538_v47 = vmul.f32 %v384_v44, %v384_v44  ;;  %v448_v58 = vpop.f32.mrb[7].mxu1  ;;  %v551_v44 = vmul.f32 %v884_v28, %v884_v28 }
  0xf3   : > { %v498_v50 = vadd.f32 %v733_v36, %v497_v46  ;;  %v569_v51 = vadd.f32 %v568_v45, %v538_v47  ;;  %v549_v36 = vmul.f32 %v886_v32, %v886_v32  ;;  %v552_v47 = vmul.f32 %v888_v33, %v888_v33 }
  0xf5   : > { %v570_v55 = vadd.f32 %v569_v51, %v539_v49  ;;  %v737_v56 = vpop.f32.mrb[8].mxu0  ;;  %v499_v57 = vadd.f32 %v734_v43, %v498_v50  ;;  %v550_v43 = vmul.f32 %v890_v38, %v890_v38 }
  0xf6   : > { %v397_v59 = vpop.f32.mrb[9].mxu0  ;;  %v753_v4 = vpop.f32.mrb[8].mxu1  ;;  %v543_v5 = vmul.f32 %v737_v56, %v737_v56 }
  0xf7   : > { %v500_v60 = vadd.f32 %v499_v57, %v397_v59  ;;  %v541_v61 = vmul.f32 %v397_v59, %v397_v59  ;;  %v571_v62 = vadd.f32 %v570_v55, %v540_v54  ;;  %v738_v63 = vpop.f32.mrb[10].mxu0  ;;  %v461_v8 = vpop.f32.mrb[9].mxu1  ;;  %v554_v57 = vmul.f32 %v448_v58, %v448_v58 }
  0xf8   : > { %v400_v0 = vpop.f32.mrb[11].mxu0  ;;  %v754_v9 = vpop.f32.mrb[10].mxu1  ;;  %v544_v10 = vmul.f32 %v738_v63, %v738_v63 }
  0xf9   : > { %v572_v1 = vadd.f32 %v571_v62, %v541_v61  ;;  %v501_v2 = vadd.f32 %v500_v60, %v400_v0  ;;  %v542_v3 = vmul.f32 %v400_v0, %v400_v0  ;;  %v464_v14 = vpop.f32.mrb[11].mxu1 }
  0xfb   : > { %v502_v6 = vadd.f32 %v737_v56, %v501_v2  ;;  %v573_v7 = vadd.f32 %v572_v1, %v542_v3  ;;  %v558_v2 = vmul.f32 %v464_v14, %v464_v14  ;;  %v559_v3 = vmul.f32 %v753_v4, %v753_v4 }
  0xfd   : > { %v574_v11 = vadd.f32 %v573_v7, %v543_v5  ;;  %v741_v12 = vpop.f32.mrb[12].mxu0  ;;  %v503_v13 = vadd.f32 %v738_v63, %v502_v6  ;;  %v557_v63 = vmul.f32 %v461_v8, %v461_v8  ;;  %v560_v6 = vmul.f32 %v754_v9, %v754_v9 }
  0xfe   : > { %v413_v15 = vpop.f32.mrb[13].mxu0  ;;  %v757_v24 = vpop.f32.mrb[12].mxu1  ;;  %v547_v25 = vmul.f32 %v741_v12, %v741_v12 }
  0xff   : > { %v504_v16 = vadd.f32 %v503_v13, %v413_v15  ;;  %v545_v17 = vmul.f32 %v413_v15, %v413_v15  ;;  %v575_v18 = vadd.f32 %v574_v11, %v544_v10  ;;  %v742_v19 = vpop.f32.mrb[14].mxu0  ;;  %v477_v29 = vpop.f32.mrb[13].mxu1 }
 0x100   : > { %v416_v20 = vpop.f32.mrb[15].mxu0  ;;  %v758_v30 = vpop.f32.mrb[14].mxu1  ;;  %v548_v31 = vmul.f32 %v742_v19, %v742_v19 }
 0x101   : > { %v576_v21 = vadd.f32 %v575_v18, %v545_v17  ;;  %v505_v22 = vadd.f32 %v504_v16, %v416_v20  ;;  %v546_v23 = vmul.f32 %v416_v20, %v416_v20  ;;  %v480_v37 = vpop.f32.mrb[15].mxu1  ;;  %v563_v17 = vmul.f32 %v757_v24, %v757_v24 }
 0x102   : > { %v562_v16 = vmul.f32 %v480_v37, %v480_v37  ;;  %v564_v18 = vmul.f32 %v758_v30, %v758_v30 }
 0x103   : > { %v506_v26 = vadd.f32 %v741_v12, %v505_v22  ;;  %v577_v27 = vadd.f32 %v576_v21, %v546_v23 }
 0x105   : > { %v578_v34 = vadd.f32 %v577_v27, %v547_v25  ;;  %v507_v35 = vadd.f32 %v742_v19, %v506_v26 }
 0x107   : > { %v508_v39 = vadd.f32 %v507_v35, %v886_v32  ;;  %v579_v40 = vadd.f32 %v578_v34, %v548_v31  ;;  %v553_v32 = vmul.f32 %v445_v52, %v445_v52  ;;  %v492_v31 = vld [vmem:[%s881_s25] sm:$0x1]  ;;  %v532_v35 = vld [vmem:[%s881_s25 + $0x1] sm:$0x1] }
 0x109   : > { %v580_v41 = vadd.f32 %v579_v40, %v549_v36  ;;  %v509_v42 = vadd.f32 %v508_v39, %v890_v38  ;;  %v555_v38 = vmul.f32 %v892_v48, %v892_v48 }
 0x10b   : > { %v510_v45 = vadd.f32 %v884_v28, %v509_v42  ;;  %v581_v46 = vadd.f32 %v580_v41, %v550_v43  ;;  %v556_v28 = vmul.f32 %v894_v53, %v894_v53 }
 0x10d   : > { %v582_v49 = vadd.f32 %v581_v46, %v551_v44  ;;  %v511_v50 = vadd.f32 %v888_v33, %v510_v45 }
 0x10f   : > { %v512_v51 = vadd.f32 %v511_v50, %v445_v52  ;;  %v583_v54 = vadd.f32 %v582_v49, %v552_v47 }
 0x111   : > { %v584_v55 = vadd.f32 %v583_v54, %v553_v32  ;;  %v513_v56 = vadd.f32 %v512_v51, %v448_v58 }
 0x113   : > { %v514_v59 = vadd.f32 %v892_v48, %v513_v56  ;;  %v585_v60 = vadd.f32 %v584_v55, %v554_v57  ;;  %v561_v48 = vmul.f32 %v477_v29, %v477_v29 }
 0x115   : > { %v586_v61 = vadd.f32 %v585_v60, %v555_v38  ;;  %v515_v62 = vadd.f32 %v894_v53, %v514_v59 }
 0x117   : > { %v516_v33 = vadd.f32 %v515_v62, %v461_v8  ;;  %v587_v0 = vadd.f32 %v586_v61, %v556_v28 }
 0x119   : > { %v588_v52 = vadd.f32 %v587_v0, %v557_v63  ;;  %v517_v1 = vadd.f32 %v516_v33, %v464_v14 }
 0x11b   : > { %v518_v58 = vadd.f32 %v753_v4, %v517_v1  ;;  %v589_v5 = vadd.f32 %v588_v52, %v558_v2 }
 0x11d   : > { %v590_v7 = vadd.f32 %v589_v5, %v559_v3  ;;  %v519_v10 = vadd.f32 %v754_v9, %v518_v58 }
 0x11f   : > { %v520_v11 = vadd.f32 %v519_v10, %v477_v29  ;;  %v591_v12 = vadd.f32 %v590_v7, %v560_v6 }
 0x121   : > { %v592_v13 = vadd.f32 %v591_v12, %v561_v48  ;;  %v521_v15 = vadd.f32 %v520_v11, %v480_v37 }
 0x123   : > { %v522_v53 = vadd.f32 %v757_v24, %v521_v15  ;;  %v593_v8 = vadd.f32 %v592_v13, %v562_v16 }
 0x125   : > { %v523_v19 = vadd.f32 %v758_v30, %v522_v53  ;;  %v594_v14 = vadd.f32 %v593_v8, %v563_v17 }
 0x127   : > { %v524_v20 = vrot.slane %v523_v19, 4  ;;  %v595_v4 = vadd.f32 %v594_v14, %v564_v18 }
 0x129   : > { %v525_v21 = vadd.f32 %v524_v20, %v523_v19  ;;  %v596_v9 = vrot.slane %v595_v4, 4 }
 0x12b   : > { %v526_v22 = vrot.slane %v525_v21, 2  ;;  %v597_v23 = vadd.f32 %v596_v9, %v595_v4 }
 0x12d   : > { %v527_v25 = vadd.f32 %v526_v22, %v525_v21  ;;  %v598_v26 = vrot.slane %v597_v23, 2 }
 0x12f   : > { %v528_v27 = vrot.slane %v527_v25, 1  ;;  %v599_v29 = vadd.f32 %v598_v26, %v597_v23 }
 0x131   : > { %v529_v34 = vadd.f32 %v528_v27, %v527_v25  ;;  %v600_v24 = vrot.slane %v599_v29, 1 }
 0x133   : > { %v530_v36 = vadd.f32 %v529_v34, %v492_v31  ;;  %v601_v37 = vadd.f32 %v600_v24, %v599_v29 }
 0x135   : > { %531 = vst [vmem:[%s881_s25] sm:$0x1] %v530_v36  ;;  %v602_v30 = vadd.f32 %v601_v37, %v532_v35 }
 0x137   : > { %603 = vst [vmem:[%s881_s25 + $0x1] sm:$0x1] %v602_v30 }
 0x138 PF: > { %s12_s9 = sadd.s32 1, %s801_s9  }
 0x139   : > { %p9_p5 = scmp.ge.s32.totalorder %s12_s9, 4  }
 0x13b   :  { %11 = sbr.rel (!%p9_p5) target bundleno = 1 (0x1), region = 58 }

// kernel: _encoder_impl.5
= control target key start
LH: loop header
LB: loop body
LE: loop exit
PB: predicated region body
PF: predicated region fallthrough
CT: control target
= control target key end

     0   :  { %s1112_s15 = smov 0   ;;  %s1319_s0 = inlined_call_operand.vmem [shape: bf16[512,36], index: 0, kind: input, shape index: {}]   ;;  %s1320_s1 = inlined_call_operand.vmem [shape: bf16[36,128], index: 1, kind: input, shape index: {}]   ;;  %s1321_s2 = inlined_call_operand.vmem [shape: f32[1,128], index: 2, kind: input, shape index: {}]   ;;  %s1322_s3 = inlined_call_operand.vmem [shape: f32[1,128], index: 3, kind: input, shape index: {}]   ;;  %s1323_s4 = inlined_call_operand.vmem [shape: bf16[512,8], index: 4, kind: output, shape index: {}]  }
   0x1 LB: > { %s875_s16 = sadd.s32 4294967295, %s1085_s15   ;;  %p879_p0 = scmp.ge.s32.totalorder %s1085_s15, 1  ;;  %s1085_s15 = sphi %s1112_s15, %s14_s15  }
   0x2   : > { %p163_p1 = scmp.lt.s32.totalorder %s1085_s15, 3 }
   0x4   : > { %p164_p2 = pnand %p879_p0, %p163_p1 }
   0x5   : > { %v1060_v0 = vld [vmem:[%s1320_s1] sm:$0xff] (!%p164_p2)   ;;  %v1061_v1 = vld [vmem:[%s1320_s1 + $0x8] sm:$0xff] (!%p164_p2)   ;;  %s880_s21 = sshll.u32 (!%p164_p2), %s875_s16, 5  ;;  %v1062_v2 = vld [vmem:[%s1320_s1 + $0x10] ss:$0 sps:$4 sm:$0x33] (!%p164_p2)  }
   0x6   : > { %167 = sbr.rel (%p164_p2) target bundleno = 269 (0x10d), region = 36  ;;  %1006 = vmatprep.subr.bf16.mxu0 (!%p164_p2), %v1060_v0  ;;  %1044 = vmatprep.subr.bf16.mxu1 (!%p164_p2), %v1060_v0  ;;  %p190_p3 = scmp.lt.s32.totalorder (!%p164_p2), %s880_s21, 63  ;;  %vm383_vm0 = vcmask (!%p164_p2), 1041408   ;;  %vm334_vm1 = vcmask (!%p164_p2), 293888   ;;  %v1174_v20 = vld [vmem:[%s1321_s2] ss:$0 sm:$0xff] (!%p164_p2) }
   0x7   : > { %1007 = vmatpush3.bf16.msra.mxu0 (!%p164_p2), %v1060_v0  ;;  %1047 = vmatpush3.bf16.msra.mxu1 (!%p164_p2), %v1060_v0  ;;  %v385_v3 = vsel (!%p164_p2), %vm383_vm0, %v1062_v2, 0  ;;  %v1179_v22 = vld [vmem:[%s1322_s3] ss:$0 sm:$0xff] (!%p164_p2)  ;;  %vm786_vm2 = vcmask (!%p164_p2), 60416  }
   0x8   : > { %1008 = vmatprep.subr.bf16.mxu0 (!%p164_p2), %v1061_v1  ;;  %1045 = vmatprep.subr.bf16.mxu1 (!%p164_p2), %v1061_v1 }
   0xb   : > { %1009 = vmatpush3.bf16.msra.mxu0 (!%p164_p2), %v1061_v1  ;;  %1048 = vmatpush3.bf16.msra.mxu1 (!%p164_p2), %v1061_v1 }
   0xc   : > { %1050 = vmatprep.subr.msk.bf16.mxu0 (!%p164_p2), %vm383_vm0, %v1062_v2  ;;  %1051 = vmatprep.subr.msk.bf16.mxu1 (!%p164_p2), %vm383_vm0, %v1062_v2 }
   0xd   : > { %s1325_s21 = smov (!%p190_p3, %s880_s21), 63 }
   0xe   : > { %s881_s24 = sshll.u32 %s1325_s21, 2 }
   0xf   : > { %s1137_s27 = scalar_lea.vmem %s1319_s0, %s881_s24  ;;  %1011 = vmatpush3.bf16.msra.mxu0 %v385_v3  ;;  %1049 = vmatpush3.bf16.msra.mxu1 %v385_v3  ;;  %s1200_s8 = scalar_lea.vmem %s1323_s4, %s881_s24 }
  0x10   : > { %v1063_v4 = vld [vmem:[%s1137_s27] sm:$0xff]   ;;  %v1065_v6 = vld [vmem:[%s1137_s27 + $0x8] sm:$0xff]   ;;  %v1067_v8 = vld [vmem:[%s1137_s27 + $0x10] sm:$0xff]  }
  0x11   : > { %v1064_v5 = vld [vmem:[%s1137_s27 + $0x40] sm:$0xff]   ;;  %1012 = vmatprep.mubr.msk.bf16.mxu0 %vm334_vm1, %v1063_v4  ;;  %v1066_v7 = vld [vmem:[%s1137_s27 + $0x48] sm:$0xff]   ;;  %v1068_v9 = vld [vmem:[%s1137_s27 + $0x50] sm:$0xff]  }
  0x12   : > { %1028 = vmatprep.mubr.msk.bf16.mxu1 %vm334_vm1, %v1064_v5  ;;  %1013 = vmatmul.mubr.msk.bf16.vlgmr.msra.gmra.mrb[0].mxu0 %vm334_vm1, %v1065_v6  ;;  %v1069_v10 = vld [vmem:[%s1137_s27 + $0x18] sm:$0xff]   ;;  %v1071_v12 = vld [vmem:[%s1137_s27 + $0x20] sm:$0xff]   ;;  %v1073_v14 = vld [vmem:[%s1137_s27 + $0x28] sm:$0xff]  }
  0x13   : > { %1029 = vmatmul.mubr.msk.bf16.vlgmr.msra.gmra.mrb[0].mxu1 %vm334_vm1, %v1066_v7  ;;  %1016 = vmatprep.mubr.msk.bf16.mxu0 %vm334_vm1, %v1067_v8  ;;  %v1070_v11 = vld [vmem:[%s1137_s27 + $0x58] sm:$0xff]   ;;  %v1072_v13 = vld [vmem:[%s1137_s27 + $0x60] sm:$0xff]   ;;  %v1074_v15 = vld [vmem:[%s1137_s27 + $0x68] sm:$0xff]  }
  0x14   : > { %1032 = vmatprep.mubr.msk.bf16.mxu1 %vm334_vm1, %v1068_v9  ;;  %v1075_v16 = vld [vmem:[%s1137_s27 + $0x30] sm:$0xff]   ;;  %v1077_v18 = vld [vmem:[%s1137_s27 + $0x38] sm:$0xff]  }
  0x15   : > { %v1076_v17 = vld [vmem:[%s1137_s27 + $0x70] sm:$0xff]   ;;  %v1078_v19 = vld [vmem:[%s1137_s27 + $0x78] sm:$0xff]  }
  0x1a   : > { %1017 = vmatmul.mubr.msk.bf16.gmra.mrb[4].mxu0 %vm334_vm1, %v1069_v10 }
  0x1b   : > { %1033 = vmatmul.mubr.msk.bf16.gmra.mrb[4].mxu1 %vm334_vm1, %v1070_v11  ;;  %1020 = vmatprep.mubr.msk.bf16.mxu0 %vm334_vm1, %v1071_v12 }
  0x1c   : > { %1036 = vmatprep.mubr.msk.bf16.mxu1 %vm334_vm1, %v1072_v13 }
  0x22   : > { %1021 = vmatmul.mubr.msk.bf16.gmra.mrb[8].mxu0 %vm334_vm1, %v1073_v14 }
  0x23   : > { %1037 = vmatmul.mubr.msk.bf16.gmra.mrb[8].mxu1 %vm334_vm1, %v1074_v15  ;;  %1024 = vmatprep.mubr.msk.bf16.mxu0 %vm334_vm1, %v1075_v16 }
  0x24   : > { %1040 = vmatprep.mubr.msk.bf16.mxu1 %vm334_vm1, %v1076_v17 }
  0x2a   : > { %1025 = vmatmul.mubr.msk.bf16.gmra.mrb[12].mxu0 %vm334_vm1, %v1077_v18 }
  0x2b   : > { %1041 = vmatmul.mubr.msk.bf16.gmra.mrb[12].mxu1 %vm334_vm1, %v1078_v19 }
  0xe5   : > { %v1014_v21 = vpop.f32.mrb[0].mxu0 }
  0xe6   : > { %v1030_v23 = vpop.f32.mrb[0].mxu1  ;;  %v557_v24 = vmul.f32 %v1014_v21, %v1174_v20  ;;  %v421_v26 = vpop.f32.mrb[1].mxu0 }
  0xe7   : > { %v573_v25 = vmul.f32 %v1030_v23, %v1174_v20  ;;  %v485_v27 = vpop.f32.mrb[1].mxu1  ;;  %v555_v28 = vmul.f32 %v1174_v20, %v421_v26  ;;  %v1015_v30 = vpop.f32.mrb[2].mxu0 }
  0xe8   : > { %v571_v29 = vmul.f32 %v1174_v20, %v485_v27  ;;  %v1031_v31 = vpop.f32.mrb[2].mxu1  ;;  %v596_v32 = vadd.f32 %v1179_v22, %v557_v24  ;;  %v558_v34 = vmul.f32 %v1015_v30, %v1174_v20  ;;  %v424_v36 = vpop.f32.mrb[3].mxu0 }
  0xe9   : > { %v612_v33 = vadd.f32 %v1179_v22, %v573_v25  ;;  %v574_v35 = vmul.f32 %v1031_v31, %v1174_v20  ;;  %v488_v37 = vpop.f32.mrb[3].mxu1  ;;  %v594_v38 = vadd.f32 %v1179_v22, %v555_v28  ;;  %v556_v40 = vmul.f32 %v1174_v20, %v424_v36 }
  0xea   : > { %v610_v39 = vadd.f32 %v1179_v22, %v571_v29  ;;  %v572_v41 = vmul.f32 %v1174_v20, %v488_v37  ;;  %v628_v42 = vmax.f32 %v596_v32, 0.0  ;;  %v597_v44 = vadd.f32 %v1179_v22, %v558_v34 }
  0xeb   : > { %v644_v43 = vmax.f32 %v612_v33, 0.0  ;;  %v613_v45 = vadd.f32 %v1179_v22, %v574_v35  ;;  %v626_v46 = vmax.f32 %v594_v38, 0.0  ;;  %v595_v48 = vadd.f32 %v1179_v22, %v556_v40 }
  0xec   : > { %v642_v47 = vmax.f32 %v610_v39, 0.0  ;;  %v611_v49 = vadd.f32 %v1179_v22, %v572_v41  ;;  %v957_v50 = vpack.c.bf16 %v628_v42, %v628_v42  ;;  %v629_v52 = vmax.f32 %v597_v44, 0.0 }
  0xed   : > { %v973_v51 = vpack.c.bf16 %v644_v43, %v644_v43  ;;  %v645_v53 = vmax.f32 %v613_v45, 0.0  ;;  %v955_v54 = vpack.c.bf16 %v626_v46, %v626_v46  ;;  %v627_v56 = vmax.f32 %v595_v48, 0.0  ;;  %v1018_v58 = vpop.f32.mrb[4].mxu0 }
  0xee   : > { %v971_v55 = vpack.c.bf16 %v642_v47, %v642_v47  ;;  %v643_v57 = vmax.f32 %v611_v49, 0.0  ;;  %v1034_v59 = vpop.f32.mrb[4].mxu1  ;;  %789 = vst.msk [vmem:[%s1200_s8 + $0x8] sm:$0xf] %vm786_vm2, %v957_v50  ;;  %v958_v60 = vpack.c.bf16 %v629_v52, %v629_v52  ;;  %v561_v62 = vmul.f32 %v1018_v58, %v1174_v20  ;;  %v437_v0 = vpop.f32.mrb[5].mxu0 }
  0xef   : > { %805 = vst.msk [vmem:[%s1200_s8 + $0x48] sm:$0xf] %vm786_vm2, %v973_v51  ;;  %v974_v61 = vpack.c.bf16 %v645_v53, %v645_v53  ;;  %v577_v63 = vmul.f32 %v1034_v59, %v1174_v20  ;;  %v501_v1 = vpop.f32.mrb[5].mxu1  ;;  %787 = vst.msk [vmem:[%s1200_s8] sm:$0xf] %vm786_vm2, %v955_v54  ;;  %v956_v2 = vpack.c.bf16 %v627_v56, %v627_v56  ;;  %v1019_v6 = vpop.f32.mrb[6].mxu0 }
  0xf0   : > { %803 = vst.msk [vmem:[%s1200_s8 + $0x40] sm:$0xf] %vm786_vm2, %v971_v55  ;;  %v972_v3 = vpack.c.bf16 %v643_v57, %v643_v57  ;;  %v559_v4 = vmul.f32 %v1174_v20, %v437_v0  ;;  %v575_v5 = vmul.f32 %v1174_v20, %v501_v1  ;;  %v1035_v7 = vpop.f32.mrb[6].mxu1  ;;  %790 = vst.msk [vmem:[%s1200_s8 + $0xc] sm:$0xf] %vm786_vm2, %v958_v60  ;;  %v440_v12 = vpop.f32.mrb[7].mxu0 }
  0xf1   : > { %806 = vst.msk [vmem:[%s1200_s8 + $0x4c] sm:$0xf] %vm786_vm2, %v974_v61  ;;  %v600_v8 = vadd.f32 %v1179_v22, %v561_v62  ;;  %v616_v9 = vadd.f32 %v1179_v22, %v577_v63  ;;  %v562_v10 = vmul.f32 %v1019_v6, %v1174_v20  ;;  %v578_v11 = vmul.f32 %v1035_v7, %v1174_v20  ;;  %v504_v13 = vpop.f32.mrb[7].mxu1 }
  0xf2   : > { %788 = vst.msk [vmem:[%s1200_s8 + $0x4] sm:$0xf] %vm786_vm2, %v956_v2  ;;  %804 = vst.msk [vmem:[%s1200_s8 + $0x44] sm:$0xf] %vm786_vm2, %v972_v3  ;;  %v598_v14 = vadd.f32 %v1179_v22, %v559_v4  ;;  %v614_v15 = vadd.f32 %v1179_v22, %v575_v5  ;;  %v560_v16 = vmul.f32 %v1174_v20, %v440_v12 }
  0xf3   : > { %v576_v17 = vmul.f32 %v1174_v20, %v504_v13  ;;  %v632_v18 = vmax.f32 %v600_v8, 0.0  ;;  %v648_v19 = vmax.f32 %v616_v9, 0.0  ;;  %v601_v21 = vadd.f32 %v1179_v22, %v562_v10 }
  0xf4   : > { %v617_v23 = vadd.f32 %v1179_v22, %v578_v11  ;;  %v630_v24 = vmax.f32 %v598_v14, 0.0  ;;  %v646_v25 = vmax.f32 %v614_v15, 0.0  ;;  %v599_v26 = vadd.f32 %v1179_v22, %v560_v16 }
  0xf5   : > { %v615_v27 = vadd.f32 %v1179_v22, %v576_v17  ;;  %v961_v28 = vpack.c.bf16 %v632_v18, %v632_v18  ;;  %v977_v29 = vpack.c.bf16 %v648_v19, %v648_v19  ;;  %v633_v30 = vmax.f32 %v601_v21, 0.0  ;;  %v1022_v36 = vpop.f32.mrb[8].mxu0 }
  0xf6   : > { %v649_v31 = vmax.f32 %v617_v23, 0.0  ;;  %v959_v32 = vpack.c.bf16 %v630_v24, %v630_v24  ;;  %v975_v33 = vpack.c.bf16 %v646_v25, %v646_v25  ;;  %v631_v34 = vmax.f32 %v599_v26, 0.0  ;;  %v1038_v37 = vpop.f32.mrb[8].mxu1  ;;  %v453_v42 = vpop.f32.mrb[9].mxu0 }
  0xf7   : > { %v647_v35 = vmax.f32 %v615_v27, 0.0  ;;  %793 = vst.msk [vmem:[%s1200_s8 + $0x18] sm:$0xf] %vm786_vm2, %v961_v28  ;;  %809 = vst.msk [vmem:[%s1200_s8 + $0x58] sm:$0xf] %vm786_vm2, %v977_v29  ;;  %v962_v38 = vpack.c.bf16 %v633_v30, %v633_v30  ;;  %v565_v40 = vmul.f32 %v1022_v36, %v1174_v20  ;;  %v581_v41 = vmul.f32 %v1038_v37, %v1174_v20  ;;  %v517_v43 = vpop.f32.mrb[9].mxu1 }
  0xf8   : > { %v978_v39 = vpack.c.bf16 %v649_v31, %v649_v31  ;;  %791 = vst.msk [vmem:[%s1200_s8 + $0x10] sm:$0xf] %vm786_vm2, %v959_v32  ;;  %807 = vst.msk [vmem:[%s1200_s8 + $0x50] sm:$0xf] %vm786_vm2, %v975_v33  ;;  %v960_v44 = vpack.c.bf16 %v631_v34, %v631_v34  ;;  %v563_v46 = vmul.f32 %v1174_v20, %v453_v42  ;;  %v1023_v48 = vpop.f32.mrb[10].mxu0  ;;  %v1039_v49 = vpop.f32.mrb[10].mxu1 }
  0xf9   : > { %v976_v45 = vpack.c.bf16 %v647_v35, %v647_v35  ;;  %v579_v47 = vmul.f32 %v1174_v20, %v517_v43  ;;  %794 = vst.msk [vmem:[%s1200_s8 + $0x1c] sm:$0xf] %vm786_vm2, %v962_v38  ;;  %v604_v50 = vadd.f32 %v1179_v22, %v565_v40  ;;  %v620_v51 = vadd.f32 %v1179_v22, %v581_v41  ;;  %v456_v54 = vpop.f32.mrb[11].mxu0  ;;  %v520_v55 = vpop.f32.mrb[11].mxu1 }
  0xfa   : > { %810 = vst.msk [vmem:[%s1200_s8 + $0x5c] sm:$0xf] %vm786_vm2, %v978_v39  ;;  %v566_v52 = vmul.f32 %v1023_v48, %v1174_v20  ;;  %v582_v53 = vmul.f32 %v1039_v49, %v1174_v20  ;;  %792 = vst.msk [vmem:[%s1200_s8 + $0x14] sm:$0xf] %vm786_vm2, %v960_v44  ;;  %v602_v56 = vadd.f32 %v1179_v22, %v563_v46 }
  0xfb   : > { %808 = vst.msk [vmem:[%s1200_s8 + $0x54] sm:$0xf] %vm786_vm2, %v976_v45  ;;  %v618_v57 = vadd.f32 %v1179_v22, %v579_v47  ;;  %v564_v58 = vmul.f32 %v1174_v20, %v456_v54  ;;  %v580_v59 = vmul.f32 %v1174_v20, %v520_v55  ;;  %v636_v60 = vmax.f32 %v604_v50, 0.0 }
  0xfc   : > { %v652_v61 = vmax.f32 %v620_v51, 0.0  ;;  %v605_v62 = vadd.f32 %v1179_v22, %v566_v52  ;;  %v621_v63 = vadd.f32 %v1179_v22, %v582_v53  ;;  %v634_v0 = vmax.f32 %v602_v56, 0.0 }
  0xfd   : > { %v650_v1 = vmax.f32 %v618_v57, 0.0  ;;  %v603_v2 = vadd.f32 %v1179_v22, %v564_v58  ;;  %v619_v3 = vadd.f32 %v1179_v22, %v580_v59  ;;  %v965_v4 = vpack.c.bf16 %v636_v60, %v636_v60  ;;  %v1026_v12 = vpop.f32.mrb[12].mxu0 }
  0xfe   : > { %v981_v5 = vpack.c.bf16 %v652_v61, %v652_v61  ;;  %v637_v6 = vmax.f32 %v605_v62, 0.0  ;;  %v653_v7 = vmax.f32 %v621_v63, 0.0  ;;  %v963_v8 = vpack.c.bf16 %v634_v0, %v634_v0  ;;  %v1042_v13 = vpop.f32.mrb[12].mxu1  ;;  %v469_v18 = vpop.f32.mrb[13].mxu0 }
  0xff   : > { %v979_v9 = vpack.c.bf16 %v650_v1, %v650_v1  ;;  %v635_v10 = vmax.f32 %v603_v2, 0.0  ;;  %v651_v11 = vmax.f32 %v619_v3, 0.0  ;;  %797 = vst.msk [vmem:[%s1200_s8 + $0x28] sm:$0xf] %vm786_vm2, %v965_v4  ;;  %v569_v16 = vmul.f32 %v1026_v12, %v1174_v20  ;;  %v533_v19 = vpop.f32.mrb[13].mxu1  ;;  %v1027_v26 = vpop.f32.mrb[14].mxu0 }
 0x100   : > { %813 = vst.msk [vmem:[%s1200_s8 + $0x68] sm:$0xf] %vm786_vm2, %v981_v5  ;;  %v966_v14 = vpack.c.bf16 %v637_v6, %v637_v6  ;;  %v982_v15 = vpack.c.bf16 %v653_v7, %v653_v7  ;;  %v585_v17 = vmul.f32 %v1042_v13, %v1174_v20  ;;  %795 = vst.msk [vmem:[%s1200_s8 + $0x20] sm:$0xf] %vm786_vm2, %v963_v8  ;;  %v1043_v27 = vpop.f32.mrb[14].mxu1  ;;  %v472_v32 = vpop.f32.mrb[15].mxu0 }
 0x101   : > { %811 = vst.msk [vmem:[%s1200_s8 + $0x60] sm:$0xf] %vm786_vm2, %v979_v9  ;;  %v964_v21 = vpack.c.bf16 %v635_v10, %v635_v10  ;;  %v980_v23 = vpack.c.bf16 %v651_v11, %v651_v11  ;;  %v567_v24 = vmul.f32 %v1174_v20, %v469_v18  ;;  %v583_v25 = vmul.f32 %v1174_v20, %v533_v19  ;;  %v536_v33 = vpop.f32.mrb[15].mxu1 }
 0x102   : > { %798 = vst.msk [vmem:[%s1200_s8 + $0x2c] sm:$0xf] %vm786_vm2, %v966_v14  ;;  %814 = vst.msk [vmem:[%s1200_s8 + $0x6c] sm:$0xf] %vm786_vm2, %v982_v15  ;;  %v608_v28 = vadd.f32 %v1179_v22, %v569_v16  ;;  %v624_v29 = vadd.f32 %v1179_v22, %v585_v17  ;;  %v570_v30 = vmul.f32 %v1027_v26, %v1174_v20 }
 0x103   : > { %v586_v31 = vmul.f32 %v1043_v27, %v1174_v20  ;;  %796 = vst.msk [vmem:[%s1200_s8 + $0x24] sm:$0xf] %vm786_vm2, %v964_v21  ;;  %812 = vst.msk [vmem:[%s1200_s8 + $0x64] sm:$0xf] %vm786_vm2, %v980_v23  ;;  %v606_v34 = vadd.f32 %v1179_v22, %v567_v24  ;;  %v622_v35 = vadd.f32 %v1179_v22, %v583_v25 }
 0x104   : > { %v568_v36 = vmul.f32 %v1174_v20, %v472_v32  ;;  %v584_v37 = vmul.f32 %v1174_v20, %v536_v33  ;;  %v640_v38 = vmax.f32 %v608_v28, 0.0  ;;  %v656_v39 = vmax.f32 %v624_v29, 0.0 }
 0x105   : > { %v609_v40 = vadd.f32 %v1179_v22, %v570_v30  ;;  %v625_v41 = vadd.f32 %v1179_v22, %v586_v31  ;;  %v638_v42 = vmax.f32 %v606_v34, 0.0  ;;  %v654_v43 = vmax.f32 %v622_v35, 0.0 }
 0x106   : > { %v607_v44 = vadd.f32 %v1179_v22, %v568_v36  ;;  %v623_v45 = vadd.f32 %v1179_v22, %v584_v37  ;;  %v969_v46 = vpack.c.bf16 %v640_v38, %v640_v38  ;;  %v985_v47 = vpack.c.bf16 %v656_v39, %v656_v39 }
 0x107   : > { %v641_v20 = vmax.f32 %v609_v40, 0.0  ;;  %v657_v48 = vmax.f32 %v625_v41, 0.0  ;;  %v967_v49 = vpack.c.bf16 %v638_v42, %v638_v42  ;;  %v983_v50 = vpack.c.bf16 %v654_v43, %v654_v43 }
 0x108   : > { %v639_v51 = vmax.f32 %v607_v44, 0.0  ;;  %v655_v52 = vmax.f32 %v623_v45, 0.0  ;;  %801 = vst.msk [vmem:[%s1200_s8 + $0x38] sm:$0xf] %vm786_vm2, %v969_v46  ;;  %817 = vst.msk [vmem:[%s1200_s8 + $0x78] sm:$0xf] %vm786_vm2, %v985_v47 }
 0x109   : > { %v970_v53 = vpack.c.bf16 %v641_v20, %v641_v20  ;;  %v986_v54 = vpack.c.bf16 %v657_v48, %v657_v48  ;;  %799 = vst.msk [vmem:[%s1200_s8 + $0x30] sm:$0xf] %vm786_vm2, %v967_v49  ;;  %815 = vst.msk [vmem:[%s1200_s8 + $0x70] sm:$0xf] %vm786_vm2, %v983_v50 }
 0x10a   : > { %v968_v22 = vpack.c.bf16 %v639_v51, %v639_v51  ;;  %v984_v55 = vpack.c.bf16 %v655_v52, %v655_v52 }
 0x10b   : > { %802 = vst.msk [vmem:[%s1200_s8 + $0x3c] sm:$0xf] %vm786_vm2, %v970_v53  ;;  %818 = vst.msk [vmem:[%s1200_s8 + $0x7c] sm:$0xf] %vm786_vm2, %v986_v54 }
 0x10c   : > { %800 = vst.msk [vmem:[%s1200_s8 + $0x34] sm:$0xf] %vm786_vm2, %v968_v22  ;;  %816 = vst.msk [vmem:[%s1200_s8 + $0x74] sm:$0xf] %vm786_vm2, %v984_v55 }
 0x10d PF: > { %s14_s15 = sadd.s32 1, %s1085_s15  }
 0x10e   : > { %p11_p4 = scmp.ge.s32.totalorder %s14_s15, 4  }
 0x110   :  { %13 = sbr.rel (!%p11_p4) target bundleno = 1 (0x1), region = 66 }

// kernel: _encoder_impl.6
= control target key start
LH: loop header
LB: loop body
LE: loop exit
PB: predicated region body
PF: predicated region fallthrough
CT: control target
= control target key end

     0   :  { %s1250_s12 = smov 0   ;;  %s1440_s0 = inlined_call_operand.vmem [shape: bf16[512,72], index: 0, kind: input, shape index: {}]   ;;  %s1441_s1 = inlined_call_operand.vmem [shape: bf16[72,128], index: 1, kind: input, shape index: {}]   ;;  %s1442_s2 = inlined_call_operand.vmem [shape: bf16[512,128], index: 2, kind: output, shape index: {0}]   ;;  %s1443_s3 = inlined_call_operand.vmem [shape: f32[16,128], index: 3, kind: output, shape index: {1}]  }
   0x1 LB: > { %s1256_s13 = sadd.s32 4294967295, %s1227_s12   ;;  %p912_p0 = scmp.ge.s32.totalorder %s1227_s12, 1  ;;  %s1227_s12 = sphi %s1250_s12, %s14_s12  }
   0x2   : > { %p141_p1 = scmp.lt.s32.totalorder %s1227_s12, 3 }
   0x4   : > { %p142_p2 = pnand %p912_p0, %p141_p1 }
   0x5   : > { %v1200_v0 = vld [vmem:[%s1441_s1] sm:$0xff] (!%p142_p2)   ;;  %v1201_v1 = vld [vmem:[%s1441_s1 + $0x8] sm:$0xff] (!%p142_p2)   ;;  %s913_s18 = sshll.u32 (!%p142_p2), %s1256_s13, 5  ;;  %v1202_v2 = vld [vmem:[%s1441_s1 + $0x10] sm:$0xff] (!%p142_p2)   ;;  %vm335_vm0 = vcmask (!%p142_p2), 588800   ;;  %vm384_vm1 = vcmask (!%p142_p2), 1043456  }
   0x6   : > { %145 = sbr.rel (%p142_p2) target bundleno = 320 (0x140), region = 28  ;;  %1137 = vmatprep.subr.bf16.mxu0 (!%p142_p2), %v1200_v0  ;;  %p170_p3 = scmp.lt.s32.totalorder (!%p142_p2), %s913_s18, 63  ;;  %1179 = vmatprep.subr.bf16.mxu1 (!%p142_p2), %v1200_v0  ;;  %v1203_v3 = vld [vmem:[%s1441_s1 + $0x18] sm:$0xff] (!%p142_p2)   ;;  %v1204_v5 = vld [vmem:[%s1441_s1 + $0x20] ss:$0 sps:$4 sm:$0xff] (!%p142_p2)   ;;  %v1229_v22 = vmov (!%p142_p2), 0.0  }
   0x7   : > { %1138 = vmatpush3.bf16.msra.mxu0 (!%p142_p2), %v1200_v0  ;;  %1184 = vmatpush3.bf16.msra.mxu1 (!%p142_p2), %v1200_v0  ;;  %v386_v6 = vsel (!%p142_p2), %vm384_vm1, %v1204_v5, 0  ;;  %p181_p4 = scmp.lt.s32.totalorder (!%p142_p2), %s1256_s13, 1 }
   0x8   : > { %1139 = vmatprep.subr.bf16.mxu0 (!%p142_p2), %v1201_v1  ;;  %1180 = vmatprep.subr.bf16.mxu1 (!%p142_p2), %v1201_v1 }
   0xb   : > { %1140 = vmatpush3.bf16.msra.mxu0 (!%p142_p2), %v1201_v1  ;;  %1185 = vmatpush3.bf16.msra.mxu1 (!%p142_p2), %v1201_v1 }
   0xc   : > { %1141 = vmatprep.subr.bf16.mxu0 (!%p142_p2), %v1202_v2  ;;  %1181 = vmatprep.subr.bf16.mxu1 (!%p142_p2), %v1202_v2 }
   0xd   : > { %s1445_s18 = smov (!%p170_p3, %s913_s18), 63  ;;  %s1447_s13 = smov (!%p181_p4, %s1256_s13), 1 }
   0xe   : > { %s914_s21 = sshll.u32 %s1445_s18, 2  ;;  %s917_s29 = sshll.u32 %s1447_s13, 3 }
   0xf   : > { %s1281_s26 = scalar_lea.vmem %s1440_s0, %s914_s21  ;;  %1142 = vmatpush3.bf16.msra.mxu0 %v1202_v2  ;;  %1186 = vmatpush3.bf16.msra.mxu1 %v1202_v2  ;;  %s1323_s5 = scalar_lea.vmem %s1443_s3, %s917_s29 }
  0x10   : > { %v1205_v4 = vld [vmem:[%s1281_s26] sm:$0xff]   ;;  %1143 = vmatprep.subr.bf16.mxu0 %v1203_v3  ;;  %1182 = vmatprep.subr.bf16.mxu1 %v1203_v3  ;;  %v1206_v7 = vld [vmem:[%s1281_s26 + $0x8] sm:$0xff]   ;;  %v1207_v9 = vld [vmem:[%s1281_s26 + $0x10] sm:$0xff]   ;;  %186 = vst [vmem:[%s1323_s5] sm:$0xff] %v1229_v22  ;;  %s1335_s8 = scalar_lea.vmem %s1442_s2, %s914_s21 }
  0x11   : > { %1147 = vmatprep.mubr.msk.bf16.mxu0 %vm335_vm0, %v1205_v4  ;;  %v1213_v8 = vld [vmem:[%s1281_s26 + $0x40] sm:$0xff]   ;;  %v1214_v10 = vld [vmem:[%s1281_s26 + $0x48] sm:$0xff]   ;;  %v1215_v11 = vld [vmem:[%s1281_s26 + $0x50] sm:$0xff]  }
  0x12   : > { %1163 = vmatprep.mubr.msk.bf16.mxu1 %vm335_vm0, %v1213_v8  ;;  %v1208_v12 = vld [vmem:[%s1281_s26 + $0x18] sm:$0xff]   ;;  %v1209_v14 = vld [vmem:[%s1281_s26 + $0x20] sm:$0xff]   ;;  %v1210_v16 = vld [vmem:[%s1281_s26 + $0x28] sm:$0xff]  }
  0x13   : > { %1144 = vmatpush3.bf16.msra.mxu0 %v1203_v3  ;;  %1187 = vmatpush3.bf16.msra.mxu1 %v1203_v3  ;;  %v1216_v13 = vld [vmem:[%s1281_s26 + $0x58] sm:$0xff]   ;;  %v1217_v15 = vld [vmem:[%s1281_s26 + $0x60] sm:$0xff]   ;;  %v1218_v17 = vld [vmem:[%s1281_s26 + $0x68] sm:$0xff]  }
  0x14   : > { %1189 = vmatprep.subr.msk.bf16.mxu0 %vm384_vm1, %v1204_v5  ;;  %1190 = vmatprep.subr.msk.bf16.mxu1 %vm384_vm1, %v1204_v5  ;;  %v1211_v18 = vld [vmem:[%s1281_s26 + $0x30] sm:$0xff]   ;;  %v1212_v20 = vld [vmem:[%s1281_s26 + $0x38] sm:$0xff]  }
  0x15   : > { %v1219_v19 = vld [vmem:[%s1281_s26 + $0x70] sm:$0xff]   ;;  %v1220_v21 = vld [vmem:[%s1281_s26 + $0x78] sm:$0xff]  }
  0x17   : > { %1146 = vmatpush3.bf16.msra.mxu0 %v386_v6  ;;  %1188 = vmatpush3.bf16.msra.mxu1 %v386_v6 }
  0x1a   : > { %1148 = vmatmul.mubr.msk.bf16.vlgmr.msra.gmra.mrb[0].mxu0 %vm335_vm0, %v1206_v7  ;;  %1164 = vmatmul.mubr.msk.bf16.vlgmr.msra.gmra.mrb[0].mxu1 %vm335_vm0, %v1214_v10 }
  0x1b   : > { %1151 = vmatprep.mubr.msk.bf16.mxu0 %vm335_vm0, %v1207_v9  ;;  %1167 = vmatprep.mubr.msk.bf16.mxu1 %vm335_vm0, %v1215_v11 }
  0x22   : > { %1152 = vmatmul.mubr.msk.bf16.gmra.mrb[4].mxu0 %vm335_vm0, %v1208_v12  ;;  %1168 = vmatmul.mubr.msk.bf16.gmra.mrb[4].mxu1 %vm335_vm0, %v1216_v13 }
  0x23   : > { %1155 = vmatprep.mubr.msk.bf16.mxu0 %vm335_vm0, %v1209_v14  ;;  %1171 = vmatprep.mubr.msk.bf16.mxu1 %vm335_vm0, %v1217_v15 }
  0x2a   : > { %1156 = vmatmul.mubr.msk.bf16.gmra.mrb[8].mxu0 %vm335_vm0, %v1210_v16  ;;  %1172 = vmatmul.mubr.msk.bf16.gmra.mrb[8].mxu1 %vm335_vm0, %v1218_v17 }
  0x2b   : > { %1159 = vmatprep.mubr.msk.bf16.mxu0 %vm335_vm0, %v1211_v18  ;;  %1175 = vmatprep.mubr.msk.bf16.mxu1 %vm335_vm0, %v1219_v19 }
  0x32   : > { %1160 = vmatmul.mubr.msk.bf16.gmra.mrb[12].mxu0 %vm335_vm0, %v1212_v20  ;;  %1176 = vmatmul.mubr.msk.bf16.gmra.mrb[12].mxu1 %vm335_vm0, %v1220_v21 }
  0xed   : > { %v1149_v23 = vpop.f32.mrb[0].mxu0  ;;  %v1326_v24 = vpop.f32.mrb[0].mxu1 }
  0xee   : > { %v422_v25 = vpop.f32.mrb[1].mxu0  ;;  %v1328_v26 = vpop.f32.mrb[1].mxu1  ;;  %v752_v38 = vmul.f32 %v1149_v23, %v1149_v23 }
  0xef   : > { %v1150_v27 = vpop.f32.mrb[2].mxu0  ;;  %v1337_v28 = vpop.f32.mrb[2].mxu1  ;;  %v750_v29 = vmul.f32 %v422_v25, %v422_v25 }
  0xf0   : > { %v1029_v30 = vpack.c.bf16 %v1150_v27, %v1149_v23  ;;  %v425_v31 = vpop.f32.mrb[3].mxu0  ;;  %v1069_v32 = vpack.c.bf16 %v1337_v28, %v1326_v24  ;;  %v1341_v33 = vpop.f32.mrb[3].mxu1  ;;  %v753_v41 = vmul.f32 %v1150_v27, %v1150_v27 }
  0xf1   : > { %v1024_v34 = vpack.c.bf16 %v425_v31, %v422_v25  ;;  %v710_v35 = vadd.f32 %v425_v31, %v422_v25  ;;  %v751_v36 = vmul.f32 %v425_v31, %v425_v31  ;;  %v1064_v37 = vpack.c.bf16 %v1341_v33, %v1328_v26 }
  0xf2   : > { %1101 = vst [vmem:[%s1335_s8 + $0x8] sm:$0xff] %v1029_v30   ;;  %1109 = vst [vmem:[%s1335_s8 + $0x48] sm:$0xff] %v1069_v32  }
  0xf3   : > { %1025 = vst [vmem:[%s1335_s8] sm:$0xff] %v1024_v34   ;;  %v711_v39 = vadd.f32 %v1149_v23, %v710_v35  ;;  %v782_v40 = vadd.f32 %v751_v36, %v750_v29  ;;  %1108 = vst [vmem:[%s1335_s8 + $0x40] sm:$0xff] %v1064_v37  }
  0xf5   : > { %v783_v42 = vadd.f32 %v782_v40, %v752_v38  ;;  %v1153_v43 = vpop.f32.mrb[4].mxu0  ;;  %v712_v44 = vadd.f32 %v1150_v27, %v711_v39  ;;  %v1349_v45 = vpop.f32.mrb[4].mxu1 }
  0xf6   : > { %v438_v46 = vpop.f32.mrb[5].mxu0  ;;  %v1351_v47 = vpop.f32.mrb[5].mxu1  ;;  %v756_v62 = vmul.f32 %v1153_v43, %v1153_v43 }
  0xf7   : > { %v713_v48 = vadd.f32 %v712_v44, %v438_v46  ;;  %v754_v49 = vmul.f32 %v438_v46, %v438_v46  ;;  %v784_v50 = vadd.f32 %v783_v42, %v753_v41  ;;  %v1154_v51 = vpop.f32.mrb[6].mxu0  ;;  %v1353_v52 = vpop.f32.mrb[6].mxu1 }
  0xf8   : > { %v1039_v53 = vpack.c.bf16 %v1154_v51, %v1153_v43  ;;  %v441_v54 = vpop.f32.mrb[7].mxu0  ;;  %v1079_v55 = vpack.c.bf16 %v1353_v52, %v1349_v45  ;;  %v1357_v56 = vpop.f32.mrb[7].mxu1  ;;  %v757_v1 = vmul.f32 %v1154_v51, %v1154_v51 }
  0xf9   : > { %v785_v57 = vadd.f32 %v784_v50, %v754_v49  ;;  %v1034_v58 = vpack.c.bf16 %v441_v54, %v438_v46  ;;  %v714_v59 = vadd.f32 %v713_v48, %v441_v54  ;;  %v755_v60 = vmul.f32 %v441_v54, %v441_v54 }
  0xfa   : > { %1103 = vst [vmem:[%s1335_s8 + $0x18] sm:$0xff] %v1039_v53   ;;  %1111 = vst [vmem:[%s1335_s8 + $0x58] sm:$0xff] %v1079_v55   ;;  %v1074_v61 = vpack.c.bf16 %v1357_v56, %v1351_v47 }
  0xfb   : > { %1102 = vst [vmem:[%s1335_s8 + $0x10] sm:$0xff] %v1034_v58   ;;  %v715_v63 = vadd.f32 %v1153_v43, %v714_v59  ;;  %v786_v0 = vadd.f32 %v785_v57, %v755_v60  ;;  %v766_v60 = vmul.f32 %v1328_v26, %v1328_v26 }
  0xfc   : > { %1110 = vst [vmem:[%s1335_s8 + $0x50] sm:$0xff] %v1074_v61  }
  0xfd   : > { %v787_v2 = vadd.f32 %v786_v0, %v756_v62  ;;  %v1157_v3 = vpop.f32.mrb[8].mxu0  ;;  %v716_v4 = vadd.f32 %v1154_v51, %v715_v63  ;;  %v1365_v5 = vpop.f32.mrb[8].mxu1 }
  0xfe   : > { %v454_v6 = vpop.f32.mrb[9].mxu0  ;;  %v1367_v7 = vpop.f32.mrb[9].mxu1  ;;  %v760_v22 = vmul.f32 %v1157_v3, %v1157_v3 }
  0xff   : > { %v717_v8 = vadd.f32 %v716_v4, %v454_v6  ;;  %v758_v9 = vmul.f32 %v454_v6, %v454_v6  ;;  %v788_v10 = vadd.f32 %v787_v2, %v757_v1  ;;  %v1158_v11 = vpop.f32.mrb[10].mxu0  ;;  %v1369_v12 = vpop.f32.mrb[10].mxu1  ;;  %v767_v1 = vmul.f32 %v1341_v33, %v1341_v33 }
 0x100   : > { %v1049_v13 = vpack.c.bf16 %v1158_v11, %v1157_v3  ;;  %v457_v14 = vpop.f32.mrb[11].mxu0  ;;  %v1089_v15 = vpack.c.bf16 %v1369_v12, %v1365_v5  ;;  %v1373_v16 = vpop.f32.mrb[11].mxu1  ;;  %v761_v27 = vmul.f32 %v1158_v11, %v1158_v11  ;;  %v768_v2 = vmul.f32 %v1326_v24, %v1326_v24 }
 0x101   : > { %v789_v17 = vadd.f32 %v788_v10, %v758_v9  ;;  %v1044_v18 = vpack.c.bf16 %v457_v14, %v454_v6  ;;  %v718_v19 = vadd.f32 %v717_v8, %v457_v14  ;;  %v759_v20 = vmul.f32 %v457_v14, %v457_v14 }
 0x102   : > { %1105 = vst [vmem:[%s1335_s8 + $0x28] sm:$0xff] %v1049_v13   ;;  %1113 = vst [vmem:[%s1335_s8 + $0x68] sm:$0xff] %v1089_v15   ;;  %v1084_v21 = vpack.c.bf16 %v1373_v16, %v1367_v7  ;;  %v769_v6 = vmul.f32 %v1337_v28, %v1337_v28  ;;  %v771_v14 = vmul.f32 %v1357_v56, %v1357_v56 }
 0x103   : > { %1104 = vst [vmem:[%s1335_s8 + $0x20] sm:$0xff] %v1044_v18   ;;  %v719_v23 = vadd.f32 %v1157_v3, %v718_v19  ;;  %v790_v25 = vadd.f32 %v789_v17, %v759_v20 }
 0x104   : > { %1112 = vst [vmem:[%s1335_s8 + $0x60] sm:$0xff] %v1084_v21  }
 0x105   : > { %v791_v29 = vadd.f32 %v790_v25, %v760_v22  ;;  %v1161_v30 = vpop.f32.mrb[12].mxu0  ;;  %v720_v31 = vadd.f32 %v1158_v11, %v719_v23  ;;  %v1381_v32 = vpop.f32.mrb[12].mxu1  ;;  %v775_v23 = vmul.f32 %v1373_v16, %v1373_v16 }
 0x106   : > { %v470_v34 = vpop.f32.mrb[13].mxu0  ;;  %v534_v35 = vpop.f32.mrb[13].mxu1  ;;  %v764_v53 = vmul.f32 %v1161_v30, %v1161_v30 }
 0x107   : > { %v721_v36 = vadd.f32 %v720_v31, %v470_v34  ;;  %v762_v37 = vmul.f32 %v470_v34, %v470_v34  ;;  %v792_v38 = vadd.f32 %v791_v29, %v761_v27  ;;  %v1162_v39 = vpop.f32.mrb[14].mxu0  ;;  %v1383_v40 = vpop.f32.mrb[14].mxu1 }
 0x108   : > { %v1059_v41 = vpack.c.bf16 %v1162_v39, %v1161_v30  ;;  %v473_v42 = vpop.f32.mrb[15].mxu0  ;;  %v1099_v43 = vpack.c.bf16 %v1383_v40, %v1381_v32  ;;  %v537_v44 = vpop.f32.mrb[15].mxu1  ;;  %v765_v57 = vmul.f32 %v1162_v39, %v1162_v39 }
 0x109   : > { %v793_v46 = vadd.f32 %v792_v38, %v762_v37  ;;  %v1054_v48 = vpack.c.bf16 %v473_v42, %v470_v34  ;;  %v722_v49 = vadd.f32 %v721_v36, %v473_v42  ;;  %v763_v50 = vmul.f32 %v473_v42, %v473_v42 }
 0x10a   : > { %1107 = vst [vmem:[%s1335_s8 + $0x38] sm:$0xff] %v1059_v41   ;;  %1115 = vst [vmem:[%s1335_s8 + $0x78] sm:$0xff] %v1099_v43   ;;  %v1094_v51 = vpack.c.bf16 %v537_v44, %v534_v35  ;;  %v779_v38 = vmul.f32 %v537_v44, %v537_v44  ;;  %v781_v41 = vmul.f32 %v1383_v40, %v1383_v40 }
 0x10b   : > { %1106 = vst [vmem:[%s1335_s8 + $0x30] sm:$0xff] %v1054_v48   ;;  %v723_v54 = vadd.f32 %v1161_v30, %v722_v49  ;;  %v794_v55 = vadd.f32 %v793_v46, %v763_v50 }
 0x10c   : > { %1114 = vst [vmem:[%s1335_s8 + $0x70] sm:$0xff] %v1094_v51  }
 0x10d   : > { %v795_v58 = vadd.f32 %v794_v55, %v764_v53  ;;  %v724_v59 = vadd.f32 %v1162_v39, %v723_v54  ;;  %v709_v54 = vld [vmem:[%s1323_s5] sm:$0x1] }
 0x10f   : > { %v725_v61 = vadd.f32 %v724_v59, %v1328_v26  ;;  %v796_v62 = vadd.f32 %v795_v58, %v765_v57  ;;  %v770_v26 = vmul.f32 %v1351_v47, %v1351_v47  ;;  %v749_v58 = vld [vmem:[%s1323_s5 + $0x1] sm:$0x1] }
 0x111   : > { %v797_v63 = vadd.f32 %v796_v62, %v766_v60  ;;  %v726_v0 = vadd.f32 %v725_v61, %v1341_v33 }
 0x113   : > { %v727_v3 = vadd.f32 %v1326_v24, %v726_v0  ;;  %v798_v4 = vadd.f32 %v797_v63, %v767_v1  ;;  %v772_v24 = vmul.f32 %v1349_v45, %v1349_v45 }
 0x115   : > { %v799_v8 = vadd.f32 %v798_v4, %v768_v2  ;;  %v728_v9 = vadd.f32 %v1337_v28, %v727_v3  ;;  %v773_v28 = vmul.f32 %v1353_v52, %v1353_v52 }
 0x117   : > { %v729_v10 = vadd.f32 %v728_v9, %v1351_v47  ;;  %v800_v11 = vadd.f32 %v799_v8, %v769_v6  ;;  %v774_v47 = vmul.f32 %v1367_v7, %v1367_v7 }
 0x119   : > { %v801_v13 = vadd.f32 %v800_v11, %v770_v26  ;;  %v730_v33 = vadd.f32 %v729_v10, %v1357_v56 }
 0x11b   : > { %v731_v15 = vadd.f32 %v1349_v45, %v730_v33  ;;  %v802_v17 = vadd.f32 %v801_v13, %v771_v14  ;;  %v776_v45 = vmul.f32 %v1365_v5, %v1365_v5 }
 0x11d   : > { %v803_v18 = vadd.f32 %v802_v17, %v772_v24  ;;  %v732_v19 = vadd.f32 %v1353_v52, %v731_v15  ;;  %v777_v52 = vmul.f32 %v1369_v12, %v1369_v12 }
 0x11f   : > { %v733_v20 = vadd.f32 %v732_v19, %v1367_v7  ;;  %v804_v21 = vadd.f32 %v803_v18, %v773_v28  ;;  %v778_v7 = vmul.f32 %v534_v35, %v534_v35 }
 0x121   : > { %v805_v22 = vadd.f32 %v804_v21, %v774_v47  ;;  %v734_v56 = vadd.f32 %v733_v20, %v1373_v16  ;;  %v780_v16 = vmul.f32 %v1381_v32, %v1381_v32 }
 0x123   : > { %v735_v25 = vadd.f32 %v1365_v5, %v734_v56  ;;  %v806_v27 = vadd.f32 %v805_v22, %v775_v23 }
 0x125   : > { %v807_v29 = vadd.f32 %v806_v27, %v776_v45  ;;  %v736_v30 = vadd.f32 %v1369_v12, %v735_v25 }
 0x127   : > { %v737_v31 = vadd.f32 %v736_v30, %v534_v35  ;;  %v808_v34 = vadd.f32 %v807_v29, %v777_v52 }
 0x129   : > { %v809_v36 = vadd.f32 %v808_v34, %v778_v7  ;;  %v738_v37 = vadd.f32 %v737_v31, %v537_v44 }
 0x12b   : > { %v739_v39 = vadd.f32 %v1381_v32, %v738_v37  ;;  %v810_v5 = vadd.f32 %v809_v36, %v779_v38 }
 0x12d   : > { %v740_v42 = vadd.f32 %v1383_v40, %v739_v39  ;;  %v811_v12 = vadd.f32 %v810_v5, %v780_v16 }
 0x12f   : > { %v741_v43 = vrot.slane %v740_v42, 4  ;;  %v812_v35 = vadd.f32 %v811_v12, %v781_v41 }
 0x131   : > { %v742_v46 = vadd.f32 %v741_v43, %v740_v42  ;;  %v813_v44 = vrot.slane %v812_v35, 4 }
 0x133   : > { %v743_v48 = vrot.slane %v742_v46, 2  ;;  %v814_v49 = vadd.f32 %v813_v44, %v812_v35 }
 0x135   : > { %v744_v50 = vadd.f32 %v743_v48, %v742_v46  ;;  %v815_v51 = vrot.slane %v814_v49, 2 }
 0x137   : > { %v745_v53 = vrot.slane %v744_v50, 1  ;;  %v816_v32 = vadd.f32 %v815_v51, %v814_v49 }
 0x139   : > { %v746_v55 = vadd.f32 %v745_v53, %v744_v50  ;;  %v817_v57 = vrot.slane %v816_v32, 1 }
 0x13b   : > { %v747_v59 = vadd.f32 %v746_v55, %v709_v54  ;;  %v818_v60 = vadd.f32 %v817_v57, %v816_v32 }
 0x13d   : > { %748 = vst [vmem:[%s1323_s5] sm:$0x1] %v747_v59  ;;  %v819_v40 = vadd.f32 %v818_v60, %v749_v58 }
 0x13f   : > { %820 = vst [vmem:[%s1323_s5 + $0x1] sm:$0x1] %v819_v40 }
 0x140 PF: > { %s14_s12 = sadd.s32 1, %s1227_s12  }
 0x141   : > { %p11_p5 = scmp.ge.s32.totalorder %s14_s12, 4  }
 0x143   :  { %13 = sbr.rel (!%p11_p5) target bundleno = 1 (0x1), region = 70 }

// kernel: _encoder_impl.7
= control target key start
LH: loop header
LB: loop body
LE: loop exit
PB: predicated region body
PF: predicated region fallthrough
CT: control target
= control target key end

     0   :  { %s795_s15 = smov 0   ;;  %s797_s16 = smov 0   ;;  %s1201_s0 = inlined_call_operand.vmem [shape: bf16[2,8,2,8,256], index: 0, kind: input, shape index: {}]   ;;  %s1202_s1 = inlined_call_operand.vmem [shape: f32[1,256], index: 1, kind: input, shape index: {}]   ;;  %s1203_s2 = inlined_call_operand.vmem [shape: f32[1,256], index: 2, kind: input, shape index: {}]   ;;  %s1204_s3 = inlined_call_operand.vmem [shape: f32[2,8,8,128], index: 3, kind: output, shape index: {0}]   ;;  %s1205_s4 = inlined_call_operand.vmem [shape: s32[2,8,8,128], index: 4, kind: output, shape index: {1}]  }
   0x1   :  { %s799_s17 = smov 0  }
   0x2 LB: > { %s27_s18 = sadd.s32 1, %s763_s16  ;;  %p708_p0 = scmp.ge.s32.totalorder %s767_s17, 1  ;;  %s767_s17 = sphi %s799_s17, %s15_s17   ;;  %s763_s16 = sphi %s797_s16, %s1219_s16   ;;  %s759_s15 = sphi %s795_s15, %s1218_s15  }
   0x3   : > { %p29_p1 = scmp.ge.s32.totalorder %s27_s18, 2  ;;  %p189_p2 = scmp.lt.s32.totalorder %s767_s17, 3 }
   0x5   : > { %s1221_s18 = smov (%p29_p1, %s27_s18), 0  ;;  %p190_p3 = pnand %p708_p0, %p189_p2 }
   0x6   : > { %p234_p4 = scmp.lt.s32.totalorder (!%p190_p3), %s759_s15, 1  ;;  %v314_v0 = vlaneseq (!%p190_p3)  ;;  %v312_v2 = vld [vmem:[%s1202_s1] sm:$0x3] (!%p190_p3) }
   0x7   : > { %193 = sbr.rel (%p190_p3) target bundleno = 76 (0x4c), region = 32  ;;  %v356_v3 = vld [vmem:[%s1203_s2] sm:$0x3] (!%p190_p3) }
   0x8   : > { %v315_v1 = vshrl.u32 (!%p190_p3), %v314_v0, 7 }
   0xa   : > { %v316_v4 = vsub.s32 (!%p190_p3), 0, %v315_v1  ;;  %v320_v5 = vsub.s32 (!%p190_p3), 1, %v315_v1  ;;  %v827_v6 = vmul.u32 (!%p190_p3), 2, %v315_v1 }
   0xc   : > { %v831_v9 = vrot.slane (!%p190_p3), %v312_v2, %v316_v4  ;;  %v833_v10 = vrot.slane (!%p190_p3), %v312_v2, %v320_v5  ;;  %v835_v11 = vrot.slane (!%p190_p3), %v356_v3, %v316_v4  ;;  %v837_v12 = vrot.slane (!%p190_p3), %v356_v3, %v320_v5 }
   0xe   : > { %s1223_s15 = smov (!%p234_p4, %s759_s15), 1 }
   0xf   : > { %s717_s23 = sshll.u32 %s1223_s15, 7  ;;  %s718_s27 = sshll.u32 %s1223_s15, 6 }
  0x10   : > { %s825_s26 = scalar_lea.vmem %s1201_s0, %s717_s23  ;;  %s890_s30 = scalar_lea.vmem %s1204_s3, %s718_s27 }
  0x11   : > { %v264_v7 = vld [vmem:[%s825_s26] sm:$0xff]  ;;  %v265_v8 = vld [vmem:[%s825_s26 + $0x8] sm:$0xff]  ;;  %v266_v13 = vld [vmem:[%s825_s26 + $0x10] sm:$0xff]  ;;  %s1107_s7 = scalar_lea.vmem %s1205_s4, %s718_s27 }
  0x12   : > { %v280_v14 = vunpack.c.l.bf16 %v264_v7  ;;  %v281_v15 = vunpack.c.h.bf16 %v264_v7  ;;  %v282_v16 = vunpack.c.l.bf16 %v265_v8  ;;  %v283_v17 = vunpack.c.h.bf16 %v265_v8  ;;  %v267_v18 = vld [vmem:[%s825_s26 + $0x18] sm:$0xff]  ;;  %v268_v39 = vld [vmem:[%s825_s26 + $0x20] sm:$0xff]  ;;  %v269_v44 = vld [vmem:[%s825_s26 + $0x28] sm:$0xff] }
  0x13   : > { %v284_v19 = vunpack.c.l.bf16 %v266_v13  ;;  %v285_v20 = vunpack.c.h.bf16 %v266_v13  ;;  %v286_v21 = vunpack.c.l.bf16 %v267_v18  ;;  %v287_v22 = vunpack.c.h.bf16 %v267_v18  ;;  %v270_v49 = vld [vmem:[%s825_s26 + $0x30] sm:$0xff]  ;;  %v271_v58 = vld [vmem:[%s825_s26 + $0x38] sm:$0xff] }
  0x14   : > { %v324_v23 = vmul.f32 %v831_v9, %v280_v14  ;;  %v325_v24 = vmul.f32 %v833_v10, %v281_v15  ;;  %v326_v25 = vmul.f32 %v831_v9, %v282_v16  ;;  %v327_v26 = vmul.f32 %v833_v10, %v283_v17  ;;  %v272_v16 = vld [vmem:[%s825_s26 + $0x40] sm:$0xff] }
  0x15   : > { %v328_v27 = vmul.f32 %v831_v9, %v284_v19  ;;  %v329_v28 = vmul.f32 %v833_v10, %v285_v20  ;;  %v330_v29 = vmul.f32 %v831_v9, %v286_v21  ;;  %v331_v30 = vmul.f32 %v833_v10, %v287_v22 }
  0x16   : > { %v850_v31 = vadd.f32 %v835_v11, %v324_v23  ;;  %v853_v32 = vadd.f32 %v837_v12, %v325_v24  ;;  %v856_v33 = vadd.f32 %v835_v11, %v326_v25  ;;  %v371_v34 = vadd.f32 %v837_v12, %v327_v26  ;;  %v273_v25 = vld [vmem:[%s825_s26 + $0x48] sm:$0xff] }
  0x17   : > { %v860_v35 = vadd.f32 %v835_v11, %v328_v27  ;;  %v863_v36 = vadd.f32 %v837_v12, %v329_v28  ;;  %v866_v37 = vadd.f32 %v835_v11, %v330_v29  ;;  %v375_v38 = vadd.f32 %v837_v12, %v331_v30 }
  0x18   : > { %v400_v40 = vmax.f32 %v850_v31, 0.0  ;;  %v401_v41 = vmax.f32 %v853_v32, 0.0  ;;  %v402_v42 = vmax.f32 %v856_v33, 0.0  ;;  %v403_v43 = vmax.f32 %v371_v34, 0.0 }
  0x19   : > { %v404_v45 = vmax.f32 %v860_v35, 0.0  ;;  %v405_v46 = vmax.f32 %v863_v36, 0.0  ;;  %v406_v47 = vmax.f32 %v866_v37, 0.0  ;;  %v407_v48 = vmax.f32 %v375_v38, 0.0 }
  0x1a   : > { %v432_v50 = vmax.f32 %v400_v40, %v401_v41  ;;  %v440_v51 = vmax.f32 %v402_v42, %v403_v43  ;;  %v288_v52 = vunpack.c.l.bf16 %v268_v39  ;;  %v289_v53 = vunpack.c.h.bf16 %v268_v39  ;;  %v274_v43 = vld [vmem:[%s825_s26 + $0x50] sm:$0xff] }
  0x1b   : > { %v433_v54 = vmax.f32 %v404_v45, %v405_v46  ;;  %v441_v55 = vmax.f32 %v406_v47, %v407_v48  ;;  %v290_v56 = vunpack.c.l.bf16 %v269_v44  ;;  %v291_v57 = vunpack.c.h.bf16 %v269_v44 }
  0x1c   : > { %v899_v59 = vmax.f32 %v432_v50, %v440_v51  ;;  %v332_v60 = vmul.f32 %v831_v9, %v288_v52  ;;  %v333_v61 = vmul.f32 %v833_v10, %v289_v53  ;;  %v292_v62 = vunpack.c.l.bf16 %v270_v49  ;;  %v275_v51 = vld [vmem:[%s825_s26 + $0x58] sm:$0xff] }
  0x1d   : > { %v903_v63 = vmax.f32 %v433_v54, %v441_v55  ;;  %v334_v0 = vmul.f32 %v831_v9, %v290_v56  ;;  %v335_v1 = vmul.f32 %v833_v10, %v291_v57  ;;  %v293_v2 = vunpack.c.h.bf16 %v270_v49 }
  0x1e   : > { %540 = vst [vmem:[%s890_s30] sm:$0xff] %v899_v59  ;;  %v910_v3 = vadd.f32 %v835_v11, %v332_v60  ;;  %v913_v4 = vadd.f32 %v837_v12, %v333_v61  ;;  %v294_v5 = vunpack.c.l.bf16 %v271_v58  ;;  %v295_v7 = vunpack.c.h.bf16 %v271_v58 }
  0x1f   : > { %541 = vst [vmem:[%s890_s30 + $0x8] sm:$0xff] %v903_v63  ;;  %v918_v8 = vadd.f32 %v835_v11, %v334_v0  ;;  %v379_v13 = vadd.f32 %v837_v12, %v335_v1  ;;  %v336_v14 = vmul.f32 %v831_v9, %v292_v62  ;;  %v337_v15 = vmul.f32 %v833_v10, %v293_v2 }
  0x20   : > { %v408_v17 = vmax.f32 %v910_v3, 0.0  ;;  %v409_v18 = vmax.f32 %v913_v4, 0.0  ;;  %v338_v19 = vmul.f32 %v831_v9, %v294_v5  ;;  %v339_v20 = vmul.f32 %v833_v10, %v295_v7 }
  0x21   : > { %v410_v21 = vmax.f32 %v918_v8, 0.0  ;;  %v411_v22 = vmax.f32 %v379_v13, 0.0  ;;  %v930_v23 = vadd.f32 %v835_v11, %v336_v14  ;;  %v933_v24 = vadd.f32 %v837_v12, %v337_v15  ;;  %v276_v14 = vld [vmem:[%s825_s26 + $0x60] sm:$0xff] }
  0x22   : > { %v434_v26 = vmax.f32 %v408_v17, %v409_v18  ;;  %v941_v27 = vadd.f32 %v835_v11, %v338_v19  ;;  %v383_v28 = vadd.f32 %v837_v12, %v339_v20  ;;  %v296_v29 = vunpack.c.l.bf16 %v272_v16 }
  0x23   : > { %v442_v30 = vmax.f32 %v410_v21, %v411_v22  ;;  %v412_v34 = vmax.f32 %v930_v23, 0.0  ;;  %v413_v38 = vmax.f32 %v933_v24, 0.0  ;;  %v297_v39 = vunpack.c.h.bf16 %v272_v16 }
  0x24   : > { %v414_v44 = vmax.f32 %v941_v27, 0.0  ;;  %v415_v48 = vmax.f32 %v383_v28, 0.0  ;;  %v298_v49 = vunpack.c.l.bf16 %v273_v25  ;;  %v299_v50 = vunpack.c.h.bf16 %v273_v25 }
  0x25   : > { %v951_v52 = vmax.f32 %v434_v26, %v442_v30  ;;  %v435_v53 = vmax.f32 %v412_v34, %v413_v38  ;;  %v340_v54 = vmul.f32 %v831_v9, %v296_v29  ;;  %v341_v55 = vmul.f32 %v833_v10, %v297_v39  ;;  %v277_v29 = vld [vmem:[%s825_s26 + $0x68] sm:$0xff] }
  0x26   : > { %v443_v56 = vmax.f32 %v414_v44, %v415_v48  ;;  %v342_v57 = vmul.f32 %v831_v9, %v298_v49  ;;  %v343_v58 = vmul.f32 %v833_v10, %v299_v50  ;;  %v300_v60 = vunpack.c.l.bf16 %v274_v43 }
  0x27   : > { %542 = vst [vmem:[%s890_s30 + $0x10] sm:$0xff] %v951_v52  ;;  %v966_v61 = vadd.f32 %v835_v11, %v340_v54  ;;  %v969_v62 = vadd.f32 %v837_v12, %v341_v55  ;;  %v301_v0 = vunpack.c.h.bf16 %v274_v43  ;;  %v302_v1 = vunpack.c.l.bf16 %v275_v51 }
  0x28   : > { %v971_v2 = vmax.f32 %v435_v53, %v443_v56  ;;  %v974_v5 = vadd.f32 %v835_v11, %v342_v57  ;;  %v387_v7 = vadd.f32 %v837_v12, %v343_v58  ;;  %v303_v13 = vunpack.c.h.bf16 %v275_v51  ;;  %v278_v58 = vld [vmem:[%s825_s26 + $0x70] sm:$0xff] }
  0x29   : > { %v416_v15 = vmax.f32 %v966_v61, 0.0  ;;  %v417_v16 = vmax.f32 %v969_v62, 0.0  ;;  %v344_v19 = vmul.f32 %v831_v9, %v300_v60  ;;  %v345_v20 = vmul.f32 %v833_v10, %v301_v0 }
  0x2a   : > { %543 = vst [vmem:[%s890_s30 + $0x18] sm:$0xff] %v971_v2  ;;  %v418_v22 = vmax.f32 %v974_v5, 0.0  ;;  %v419_v25 = vmax.f32 %v387_v7, 0.0  ;;  %v346_v26 = vmul.f32 %v831_v9, %v302_v1  ;;  %v347_v28 = vmul.f32 %v833_v10, %v303_v13  ;;  %v279_v13 = vld [vmem:[%s825_s26 + $0x78] sm:$0xff] }
  0x2b   : > { %v436_v30 = vmax.f32 %v416_v15, %v417_v16  ;;  %v993_v39 = vadd.f32 %v835_v11, %v344_v19  ;;  %v996_v43 = vadd.f32 %v837_v12, %v345_v20  ;;  %v304_v48 = vunpack.c.l.bf16 %v276_v14 }
  0x2c   : > { %v444_v49 = vmax.f32 %v418_v22, %v419_v25  ;;  %v1001_v50 = vadd.f32 %v835_v11, %v346_v26  ;;  %v391_v51 = vadd.f32 %v837_v12, %v347_v28  ;;  %v305_v53 = vunpack.c.h.bf16 %v276_v14 }
  0x2d   : > { %v420_v54 = vmax.f32 %v993_v39, 0.0  ;;  %v1207_v55 = vmax.f32 %v996_v43, 0.0  ;;  %v306_v56 = vunpack.c.l.bf16 %v277_v29  ;;  %v307_v57 = vunpack.c.h.bf16 %v277_v29 }
  0x2e   : > { %v1007_v60 = vmax.f32 %v436_v30, %v444_v49  ;;  %v1206_v0 = vmax.f32 %v1001_v50, 0.0  ;;  %v423_v1 = vmax.f32 %v391_v51, 0.0  ;;  %v348_v7 = vmul.f32 %v831_v9, %v304_v48 }
  0x2f   : > { %v437_v14 = vmax.f32 %v420_v54, %v1207_v55  ;;  %v349_v19 = vmul.f32 %v833_v10, %v305_v53  ;;  %v350_v20 = vmul.f32 %v831_v9, %v306_v56  ;;  %v351_v25 = vmul.f32 %v833_v10, %v307_v57 }
  0x30   : > { %544 = vst [vmem:[%s890_s30 + $0x20] sm:$0xff] %v1007_v60  ;;  %v445_v26 = vmax.f32 %v1206_v0, %v423_v1  ;;  %v1024_v28 = vadd.f32 %v835_v11, %v348_v7  ;;  %v308_v29 = vunpack.c.l.bf16 %v278_v58  ;;  %v309_v30 = vunpack.c.h.bf16 %v278_v58 }
  0x31   : > { %v1027_v48 = vadd.f32 %v837_v12, %v349_v19  ;;  %v1030_v49 = vadd.f32 %v835_v11, %v350_v20  ;;  %v395_v51 = vadd.f32 %v837_v12, %v351_v25  ;;  %v310_v53 = vunpack.c.l.bf16 %v279_v13 }
  0x32   : > { %v1033_v56 = vmax.f32 %v437_v14, %v445_v26  ;;  %v424_v57 = vmax.f32 %v1024_v28, 0.0  ;;  %v311_v1 = vunpack.c.h.bf16 %v279_v13  ;;  %v352_v0 = vmul.f32 %v831_v9, %v308_v29 }
  0x33   : > { %v425_v7 = vmax.f32 %v1027_v48, 0.0  ;;  %v426_v58 = vmax.f32 %v1030_v49, 0.0  ;;  %v427_v55 = vmax.f32 %v395_v51, 0.0  ;;  %v353_v19 = vmul.f32 %v833_v10, %v309_v30 }
  0x34   : > { %545 = vst [vmem:[%s890_s30 + $0x28] sm:$0xff] %v1033_v56  ;;  %v354_v20 = vmul.f32 %v831_v9, %v310_v53  ;;  %v355_v25 = vmul.f32 %v833_v10, %v311_v1  ;;  %v1045_v14 = vadd.f32 %v835_v11, %v352_v0  ;;  %vm1050_vm0 = vcmp.eq.f32.partialorder %v400_v40, %v899_v59 }
  0x35   : > { %v438_v26 = vmax.f32 %v424_v57, %v425_v7  ;;  %v446_v9 = vmax.f32 %v426_v58, %v427_v55  ;;  %v1061_v10 = vadd.f32 %v837_v12, %v353_v19  ;;  %vm1066_vm1 = vcmp.eq.f32.partialorder %v401_v41, %v899_v59 }
  0x36   : > { %v1071_v40 = vadd.f32 %v835_v11, %v354_v20  ;;  %v399_v0 = vadd.f32 %v837_v12, %v355_v25  ;;  %v428_v29 = vmax.f32 %v1045_v14, 0.0  ;;  %vm472_vm2 = vcmp.eq.f32.partialorder %v402_v42, %v899_v59 }
  0x37   : > { %v454_v55 = vmax.f32 %v438_v26, %v446_v9  ;;  %v429_v30 = vmax.f32 %v1061_v10, 0.0  ;;  %v769_v32 = vmov 17   ;;  %vm1083_vm3 = vcmp.eq.f32.partialorder %v404_v45, %v903_v63 }
  0x38   : > { %v480_v41 = vsel %vm472_vm2, 16, %v769_v32  ;;  %v430_v12 = vmax.f32 %v1071_v40, 0.0  ;;  %v431_v51 = vmax.f32 %v399_v0, 0.0  ;;  %vm1093_vm4 = vcmp.eq.f32.partialorder %v405_v46, %v903_v63 }
  0x39   : > { %v488_v33 = vsel %vm1066_vm1, 1, %v480_v41  ;;  %546 = vst [vmem:[%s890_s30 + $0x30] sm:$0xff] %v454_v55  ;;  %v439_v35 = vmax.f32 %v428_v29, %v429_v30  ;;  %vm473_vm5 = vcmp.eq.f32.partialorder %v406_v47, %v903_v63  ;;  %v533_v45 = vadd.s32 32, %v827_v6 }
  0x3a   : > { %v496_v36 = vsel %vm1050_vm0, 0, %v488_v33  ;;  %v447_v46 = vmax.f32 %v430_v12, %v431_v51  ;;  %v481_v53 = vsel %vm473_vm5, 16, %v769_v32  ;;  %vm458_vm6 = vcmp.eq.f32.partialorder %v408_v17, %v951_v52 }
  0x3b   : > { %v548_v59 = vadd.s32 %v827_v6, %v496_v36  ;;  %v489_v1 = vsel %vm1093_vm4, 1, %v481_v53  ;;  %vm466_vm7 = vcmp.eq.f32.partialorder %v409_v18, %v951_v52  ;;  %vm474_vm8 = vcmp.eq.f32.partialorder %v410_v21, %v951_v52 }
  0x3c   : > { %v534_v37 = vadd.s32 64, %v827_v6  ;;  %v455_v47 = vmax.f32 %v439_v35, %v447_v46  ;;  %v497_v63 = vsel %vm1083_vm3, 0, %v489_v1  ;;  %v482_v3 = vsel %vm474_vm8, 16, %v769_v32 }
  0x3d   : > { %556 = vst [vmem:[%s1107_s7] sm:$0xff] %v548_v59  ;;  %vm459_vm9 = vcmp.eq.f32.partialorder %v412_v34, %v971_v2  ;;  %v549_v4 = vadd.s32 %v533_v45, %v497_v63  ;;  %v490_v17 = vsel %vm466_vm7, 1, %v482_v3  ;;  %vm467_vm10 = vcmp.eq.f32.partialorder %v413_v38, %v971_v2 }
  0x3e   : > { %vm475_vm11 = vcmp.eq.f32.partialorder %v414_v44, %v971_v2  ;;  %547 = vst [vmem:[%s890_s30 + $0x38] sm:$0xff] %v455_v47  ;;  %v498_v8 = vsel %vm458_vm6, 0, %v490_v17  ;;  %v535_v21 = vadd.s32 96, %v827_v6  ;;  %vm460_vm12 = vcmp.eq.f32.partialorder %v416_v15, %v1007_v60 }
  0x3f   : > { %v483_v18 = vsel %vm475_vm11, 16, %v769_v32  ;;  %557 = vst [vmem:[%s1107_s7 + $0x8] sm:$0xff] %v549_v4  ;;  %v550_v23 = vadd.s32 %v534_v37, %v498_v8  ;;  %vm468_vm13 = vcmp.eq.f32.partialorder %v417_v16, %v1007_v60  ;;  %vm476_vm14 = vcmp.eq.f32.partialorder %v418_v22, %v1007_v60 }
  0x40   : > { %v491_v34 = vsel %vm467_vm10, 1, %v483_v18  ;;  %v484_v27 = vsel %vm476_vm14, 16, %v769_v32  ;;  %v536_v38 = vadd.s32 128, %v827_v6  ;;  %vm461_vm15 = vcmp.eq.f32.partialorder %v420_v54, %v1033_v56 }
  0x41   : > { %v499_v24 = vsel %vm459_vm9, 0, %v491_v34  ;;  %558 = vst [vmem:[%s1107_s7 + $0x10] sm:$0xff] %v550_v23  ;;  %v492_v52 = vsel %vm468_vm13, 1, %v484_v27  ;;  %v1216_v61 = vmax.f32 %v996_v43, 0.0  ;;  %v1217_v62 = vmax.f32 %v1001_v50, 0.0 }
  0x42   : > { %v551_v44 = vadd.s32 %v535_v21, %v499_v24  ;;  %v500_v2 = vsel %vm460_vm12, 0, %v492_v52  ;;  %v537_v15 = vadd.s32 160, %v827_v6  ;;  %vm462_vm2 = vcmp.eq.f32.partialorder %v424_v57, %v454_v55 }
  0x43   : > { %vm469_vm0 = vcmp.eq.f32.partialorder %v1216_v61, %v1033_v56  ;;  %vm477_vm1 = vcmp.eq.f32.partialorder %v1217_v62, %v1033_v56  ;;  %v552_v16 = vadd.s32 %v536_v38, %v500_v2  ;;  %vm470_vm3 = vcmp.eq.f32.partialorder %v425_v7, %v454_v55 }
  0x44   : > { %v485_v5 = vsel %vm477_vm1, 16, %v769_v32  ;;  %559 = vst [vmem:[%s1107_s7 + $0x18] sm:$0xff] %v551_v44  ;;  %vm478_vm4 = vcmp.eq.f32.partialorder %v426_v58, %v454_v55  ;;  %v538_v50 = vadd.s32 192, %v827_v6  ;;  %vm463_vm5 = vcmp.eq.f32.partialorder %v428_v29, %v455_v47 }
  0x45   : > { %v493_v22 = vsel %vm469_vm0, 1, %v485_v5  ;;  %v486_v43 = vsel %vm478_vm4, 16, %v769_v32  ;;  %560 = vst [vmem:[%s1107_s7 + $0x20] sm:$0xff] %v552_v16  ;;  %vm471_vm6 = vcmp.eq.f32.partialorder %v429_v30, %v455_v47  ;;  %vm479_vm7 = vcmp.eq.f32.partialorder %v430_v12, %v455_v47 }
  0x46   : > { %v501_v39 = vsel %vm461_vm15, 0, %v493_v22  ;;  %v494_v60 = vsel %vm470_vm3, 1, %v486_v43  ;;  %v487_v48 = vsel %vm479_vm7, 16, %v769_v32  ;;  %v539_v49 = vadd.s32 224, %v827_v6 }
  0x47   : > { %v553_v54 = vadd.s32 %v537_v15, %v501_v39  ;;  %v502_v28 = vsel %vm462_vm2, 0, %v494_v60  ;;  %v495_v57 = vsel %vm471_vm6, 1, %v487_v48 }
  0x48   : > { %v554_v56 = vadd.s32 %v538_v50, %v502_v28  ;;  %v503_v7 = vsel %vm463_vm5, 0, %v495_v57 }
  0x49   : > { %561 = vst [vmem:[%s1107_s7 + $0x28] sm:$0xff] %v553_v54  ;;  %v555_v58 = vadd.s32 %v539_v49, %v503_v7 }
  0x4a   : > { %562 = vst [vmem:[%s1107_s7 + $0x30] sm:$0xff] %v554_v56 }
  0x4b   : > { %563 = vst [vmem:[%s1107_s7 + $0x38] sm:$0xff] %v555_v58 }
  0x4c PF: > { %s15_s17 = sadd.s32 1, %s767_s17   ;;  %s1218_s15 = smov %s763_s16 }
  0x4d   : > { %p12_p5 = scmp.ge.s32.totalorder %s15_s17, 4   ;;  %s1219_s16 = smov %s1221_s18 }
  0x4f   :  { %14 = sbr.rel (!%p12_p5) target bundleno = 2 (0x2), region = 74 }

</bundles_post_ra>
